<compile_context>
chip_gen: v7x
topology: tpu7x:2x2x1
jax: 0.10.0
libtpu: 0.0.40
codegen_flags: <defaults>
</compile_context>

<pallas_src>
import functools

import jax
import jax.numpy as jnp
from jax.experimental import pallas as pl
from jax.experimental.pallas import tpu as pltpu

BN_EPS = 1e-5
OUT_PAD = 128          # lane-dense fused output width
H1 = 512               # grade-branch first hidden
H2 = 256               # grade-branch second hidden == ordinal hidden


def _gelu(x):
    # Exact erf-based GELU -- matches torch.nn.GELU() default.
    return 0.5 * x * (1.0 + jax.lax.erf(x * 0.7071067811865476))


def grade_head_kernel(x_ref, w_in_ref, b_in_ref, w2_ref, b2_ref,
                      w_out_ref, b_out_ref, out_ref):
    # x tile: (TB, F) f32 -> bf16 for the MXU (cast inside the kernel, not in
    # the wrapper, to avoid an extra full HBM pass over the activations).
    x = x_ref[...].astype(jnp.bfloat16)

    # Fused first stage: (TB,F) @ (F, 768) = [grade 512 | ordinal 256].
    # BN1 is folded into the grade half; both branches apply GELU here.
    h = jnp.dot(x, w_in_ref[...], preferred_element_type=jnp.float32) + b_in_ref[...]
    h = _gelu(h)
    g = h[:, :H1]          # grade branch hidden  (TB, 512), lane-aligned slice
    o = h[:, H1:]          # ordinal branch hidden (TB, 256), lane-aligned slice

    # Grade branch second stage: Linear(512,256) with BN2 folded in, GELU.
    g2 = jnp.dot(g.astype(jnp.bfloat16), w2_ref[...],
                 preferred_element_type=jnp.float32) + b2_ref[...]
    g2 = _gelu(g2)

    # Fused output heads: [g2 | o] (TB,512) @ block-packed (512,128) weight.
    #   rows [0,256)   -> w3  -> lanes [0, num_grades)
    #   rows [256,512) -> wo2 -> lanes [num_grades, 2*num_grades-1)
    cat = jnp.concatenate([g2, o], axis=-1).astype(jnp.bfloat16)
    out = jnp.dot(cat, w_out_ref[...],
                  preferred_element_type=jnp.float32) + b_out_ref[...]
    out_ref[...] = out.astype(out_ref.dtype)     # single lane-dense bf16 store


def _fold_bn(w, b, gamma, beta, rmean, rvar):
    """Fold eval-mode BatchNorm1d into the preceding Linear (W stored as (in,out))."""
    scale = gamma * jax.lax.rsqrt(rvar + BN_EPS)            # (1, out)
    return w * scale, (b - rmean) * scale + beta


def _pick_tb(batch):
    """Batch tile: big enough to amortize per-step overhead, >=2 tiles when large."""
    r8 = ((batch + 7) // 8) * 8
    cap = 1024 if batch >= 4096 else 512
    tb = min(cap, r8)
    if batch >= 256 and pl.cdiv(batch, tb) < 2:
        # keep the "parallel" batch axis shardable across v7x's 2 TensorCores
        tb = max(8, ((r8 // 2 + 7) // 8) * 8)
    return tb


def _vmem_bytes(tb, feat):
    """Rough VMEM budget: double-buffered operands + intermediates + slack."""
    x_blk = tb * feat * 4
    out_blk = tb * OUT_PAD * 2
    w_bytes = (feat * (H1 + H2) + H1 * H2 + (H2 + H2) * OUT_PAD) * 2   # bf16
    b_bytes = (H1 + H2 + H2 + OUT_PAD) * 4                             # f32
    inter = tb * ((H1 + H2) * 4 + H2 * 4 + (H2 + H2) * 2 + OUT_PAD * 4)
    return 2 * (x_blk + out_blk + w_bytes + b_bytes) + inter + (2 << 20)


@jax.jit
def grade_consistency_head(x, params):
    """Returns (logits, ordinal_thresholds), matching the PyTorch forward (eval mode)."""
    batch, feat = x.shape
    num_grades = params["w3"].shape[1]
    assert 2 * num_grades - 1 <= OUT_PAD

    # ---- constant-fold BN into the linears, fuse weights (tiny, once/call) ----
    w1, b1 = _fold_bn(params["w1"], params["b1"], params["g1"], params["be1"],
                      params["rm1"], params["rv1"])
    w2, b2 = _fold_bn(params["w2"], params["b2"], params["g2"], params["be2"],
                      params["rm2"], params["rv2"])

    # Fused first-stage weight: (F, 768) = [grade (BN-folded) | ordinal].
    w_in = jnp.concatenate([w1, params["wo1"]], axis=1).astype(jnp.bfloat16)
    b_in = jnp.concatenate([b1, params["bo1"]], axis=1)

    # Fused, block-packed output head: (512, 128).
    w_out = jnp.zeros((H2 + H2, OUT_PAD), jnp.float32)
    w_out = w_out.at[:H2, :num_grades].set(params["w3"])
    w_out = w_out.at[H2:, num_grades:2 * num_grades - 1].set(params["wo2"])
    b_out = jnp.zeros((1, OUT_PAD), jnp.float32)
    b_out = b_out.at[:, :num_grades].set(params["b3"])
    b_out = b_out.at[:, num_grades:2 * num_grades - 1].set(params["bo2"])
    w_out = w_out.astype(jnp.bfloat16)
    w2 = w2.astype(jnp.bfloat16)

    # ---- grid: tile the batch; no wrapper-side pad/cast of x ----
    tb = _pick_tb(batch)
    num_tiles = pl.cdiv(batch, tb)
    padded_rows = num_tiles * tb

    resident = lambda a: pl.BlockSpec(a.shape, lambda i: (0, 0))

    out = pl.pallas_call(
        grade_head_kernel,
        out_shape=jax.ShapeDtypeStruct((padded_rows, OUT_PAD), jnp.bfloat16),
        grid=(num_tiles,),
        in_specs=[
            pl.BlockSpec((tb, feat), lambda i: (i, 0)),   # x tile (pipelined, ragged-safe)
            resident(w_in), resident(b_in),
            resident(w2), resident(b2),
            resident(w_out), resident(b_out),
        ],
        out_specs=pl.BlockSpec((tb, OUT_PAD), lambda i: (i, 0)),
        compiler_params=pltpu.CompilerParams(
            dimension_semantics=("parallel",),
            vmem_limit_bytes=int(min(max(_vmem_bytes(tb, feat), 16 * 2**20),
                                     64 * 2**20)),
        ),
    )(x, w_in, b_in, w2, b2, w_out, b_out)

    logits = out[:batch, :num_grades].astype(jnp.float32)
    ordinal = out[:batch, num_grades:2 * num_grades - 1].astype(jnp.float32)
    return logits, ordinal


def init_params(key, feature_dim, num_grades=5):
    """Deterministic synthetic init matching the module's parameter shapes.

    Linear weights are stored pre-transposed as (in, out) = torch_weight.T.
    """
    ks = jax.random.split(key, 10)

    def lin(kw, kb, fan_in, fan_out):
        w = jax.random.normal(kw, (fan_in, fan_out), jnp.float32) * 0.02
        b = jax.random.normal(kb, (1, fan_out), jnp.float32) * 0.01
        return w, b

    p = {}
    # grade_predictor
    p["w1"], p["b1"] = lin(ks[0], ks[1], feature_dim, H1)
    p["w2"], p["b2"] = lin(ks[2], ks[3], H1, H2)
    p["w3"], p["b3"] = lin(ks[4], ks[5], H2, num_grades)
    # BatchNorm1d defaults (eval-mode running stats)
    for dim, tag in ((H1, "1"), (H2, "2")):
        p["g" + tag] = jnp.ones((1, dim), jnp.float32)      # gamma
        p["be" + tag] = jnp.zeros((1, dim), jnp.float32)    # beta
        p["rm" + tag] = jnp.zeros((1, dim), jnp.float32)    # running_mean
        p["rv" + tag] = jnp.ones((1, dim), jnp.float32)     # running_var
    # ordinal_encoder
    p["wo1"], p["bo1"] = lin(ks[6], ks[7], feature_dim, H2)
    p["wo2"], p["bo2"] = lin(ks[8], ks[9], H2, num_grades - 1)
    return p


def reference_forward(x, p):
    """Pure-JAX f32 reference (eval-mode PyTorch semantics) for validation."""
    def bn(h, g, be, rm, rv):
        return (h - rm) * jax.lax.rsqrt(rv + BN_EPS) * g + be

    gelu = functools.partial(jax.nn.gelu, approximate=False)
    h = x @ p["w1"] + p["b1"]
    h = gelu(bn(h, p["g1"], p["be1"], p["rm1"], p["rv1"]))
    h = h @ p["w2"] + p["b2"]
    h = gelu(bn(h, p["g2"], p["be2"], p["rm2"], p["rv2"]))
    logits = h @ p["w3"] + p["b3"]

    o = gelu(x @ p["wo1"] + p["bo1"])
    ordinal = o @ p["wo2"] + p["bo2"]
    return logits, ordinal


if __name__ == "__main__":
    key = jax.random.PRNGKey(0)
    kx, kp = jax.random.split(key)

    batch, feature_dim, num_grades = 64, 32, 5
    x = jax.random.normal(kx, (batch, feature_dim), jnp.float32)
    params = init_params(kp, feature_dim, num_grades)

    logits, ordinal = grade_consistency_head(x, params)
    jax.block_until_ready((logits, ordinal))

    ref_logits, ref_ordinal = reference_forward(x, params)
    assert logits.shape == (batch, num_grades)
    assert ordinal.shape == (batch, num_grades - 1)
    # bf16 MXU operands + bf16 fused output (f32 accumulation) -> relaxed tol.
    assert jnp.allclose(logits, ref_logits, rtol=5e-2, atol=2e-2), \
        float(jnp.max(jnp.abs(logits - ref_logits)))
    assert jnp.allclose(ordinal, ref_ordinal, rtol=5e-2, atol=2e-2), \
        float(jnp.max(jnp.abs(ordinal - ref_ordinal)))

    print("KERNEL_OK")
</pallas_src>

<mosaic_0001>
module attributes {stable_mosaic.version = 11 : i64} {
  func.func @grade_head_kernel(%arg0: i32, %arg1: memref<64x32xf32, #tpu.memory_space<vmem>>, %arg2: memref<32x768xbf16, #tpu.memory_space<vmem>>, %arg3: memref<1x768xf32, #tpu.memory_space<vmem>>, %arg4: memref<512x256xbf16, #tpu.memory_space<vmem>>, %arg5: memref<1x256xf32, #tpu.memory_space<vmem>>, %arg6: memref<512x128xbf16, #tpu.memory_space<vmem>>, %arg7: memref<1x128xf32, #tpu.memory_space<vmem>>, %arg8: memref<64x128xbf16, #tpu.memory_space<vmem>>) attributes {dimension_semantics = [#tpu.dimension_semantics<parallel>], iteration_bounds = array<i64: 1>, scalar_prefetch = 0 : i64, scratch_operands = 0 : i64, tpu.core_type = #tpu.core_type<tc>, window_params = [{transform_indices = @transform_0, window_bounds = array<i64: 64, 32>}, {pipeline_mode = #tpu.pipeline_mode<synchronous>, transform_indices = @transform_1, window_bounds = array<i64: 32, 768>}, {pipeline_mode = #tpu.pipeline_mode<synchronous>, transform_indices = @transform_2, window_bounds = array<i64: 1, 768>}, {pipeline_mode = #tpu.pipeline_mode<synchronous>, transform_indices = @transform_3, window_bounds = array<i64: 512, 256>}, {pipeline_mode = #tpu.pipeline_mode<synchronous>, transform_indices = @transform_4, window_bounds = array<i64: 1, 256>}, {pipeline_mode = #tpu.pipeline_mode<synchronous>, transform_indices = @transform_5, window_bounds = array<i64: 512, 128>}, {pipeline_mode = #tpu.pipeline_mode<synchronous>, transform_indices = @transform_6, window_bounds = array<i64: 1, 128>}, {transform_indices = @transform_7, window_bounds = array<i64: 64, 128>}]} {
    %c0 = arith.constant 0 : index
    %c0_0 = arith.constant 0 : index
    %0 = vector.load %arg1[%c0, %c0_0] : memref<64x32xf32, #tpu.memory_space<vmem>>, vector<64x32xf32>
    %1 = arith.truncf %0 : vector<64x32xf32> to vector<64x32xbf16>
    %c0_1 = arith.constant 0 : index
    %c0_2 = arith.constant 0 : index
    %2 = vector.load %arg2[%c0_1, %c0_2] : memref<32x768xbf16, #tpu.memory_space<vmem>>, vector<32x768xbf16>
    %cst = arith.constant dense<0.000000e+00> : vector<64x768xf32>
    %3 = tpu.matmul %1, %2, %cst {dimension_numbers = #tpu.dot_dimension_numbers<[1], [0], [0], [1], [0, 0, 1, 1], [], []>} : vector<64x32xbf16>, vector<32x768xbf16>, vector<64x768xf32> -> vector<64x768xf32>
    %c0_3 = arith.constant 0 : index
    %c0_4 = arith.constant 0 : index
    %4 = vector.load %arg3[%c0_3, %c0_4] : memref<1x768xf32, #tpu.memory_space<vmem>>, vector<1x768xf32>
    %5 = vector.broadcast %4 : vector<1x768xf32> to vector<64x768xf32>
    %6 = arith.addf %3, %5 : vector<64x768xf32>
    %cst_5 = arith.constant 5.000000e-01 : f32
    %7 = vector.broadcast %cst_5 : f32 to vector<64x768xf32>
    %8 = arith.mulf %7, %6 : vector<64x768xf32>
    %cst_6 = arith.constant 0.707106769 : f32
    %9 = vector.broadcast %cst_6 : f32 to vector<64x768xf32>
    %10 = arith.mulf %6, %9 : vector<64x768xf32>
    %11 = math.erf %10 : vector<64x768xf32>
    %cst_7 = arith.constant 1.000000e+00 : f32
    %12 = vector.broadcast %cst_7 : f32 to vector<64x768xf32>
    %13 = arith.addf %12, %11 : vector<64x768xf32>
    %14 = arith.mulf %8, %13 : vector<64x768xf32>
    %15 = vector.extract_strided_slice %14 {offsets = [0, 0], sizes = [64, 512], strides = [1, 1]} : vector<64x768xf32> to vector<64x512xf32>
    %16 = vector.extract_strided_slice %14 {offsets = [0, 512], sizes = [64, 256], strides = [1, 1]} : vector<64x768xf32> to vector<64x256xf32>
    %17 = arith.truncf %15 : vector<64x512xf32> to vector<64x512xbf16>
    %c0_8 = arith.constant 0 : index
    %c0_9 = arith.constant 0 : index
    %18 = vector.load %arg4[%c0_8, %c0_9] : memref<512x256xbf16, #tpu.memory_space<vmem>>, vector<512x256xbf16>
    %cst_10 = arith.constant dense<0.000000e+00> : vector<64x256xf32>
    %19 = tpu.matmul %17, %18, %cst_10 {dimension_numbers = #tpu.dot_dimension_numbers<[1], [0], [0], [1], [0, 0, 1, 1], [], []>} : vector<64x512xbf16>, vector<512x256xbf16>, vector<64x256xf32> -> vector<64x256xf32>
    %c0_11 = arith.constant 0 : index
    %c0_12 = arith.constant 0 : index
    %20 = vector.load %arg5[%c0_11, %c0_12] : memref<1x256xf32, #tpu.memory_space<vmem>>, vector<1x256xf32>
    %21 = vector.broadcast %20 : vector<1x256xf32> to vector<64x256xf32>
    %22 = arith.addf %19, %21 : vector<64x256xf32>
    %cst_13 = arith.constant 5.000000e-01 : f32
    %23 = vector.broadcast %cst_13 : f32 to vector<64x256xf32>
    %24 = arith.mulf %23, %22 : vector<64x256xf32>
    %cst_14 = arith.constant 0.707106769 : f32
    %25 = vector.broadcast %cst_14 : f32 to vector<64x256xf32>
    %26 = arith.mulf %22, %25 : vector<64x256xf32>
    %27 = math.erf %26 : vector<64x256xf32>
    %cst_15 = arith.constant 1.000000e+00 : f32
    %28 = vector.broadcast %cst_15 : f32 to vector<64x256xf32>
    %29 = arith.addf %28, %27 : vector<64x256xf32>
    %30 = arith.mulf %24, %29 : vector<64x256xf32>
    %31 = tpu.concatenate %30, %16 in 1 : vector<64x256xf32>, vector<64x256xf32> -> vector<64x512xf32>
    %32 = arith.truncf %31 : vector<64x512xf32> to vector<64x512xbf16>
    %c0_16 = arith.constant 0 : index
    %c0_17 = arith.constant 0 : index
    %33 = vector.load %arg6[%c0_16, %c0_17] : memref<512x128xbf16, #tpu.memory_space<vmem>>, vector<512x128xbf16>
    %cst_18 = arith.constant dense<0.000000e+00> : vector<64x128xf32>
    %34 = tpu.matmul %32, %33, %cst_18 {dimension_numbers = #tpu.dot_dimension_numbers<[1], [0], [0], [1], [0, 0, 1, 1], [], []>} : vector<64x512xbf16>, vector<512x128xbf16>, vector<64x128xf32> -> vector<64x128xf32>
    %c0_19 = arith.constant 0 : index
    %c0_20 = arith.constant 0 : index
    %35 = vector.load %arg7[%c0_19, %c0_20] : memref<1x128xf32, #tpu.memory_space<vmem>>, vector<1x128xf32>
    %36 = vector.broadcast %35 : vector<1x128xf32> to vector<64x128xf32>
    %37 = arith.addf %34, %36 : vector<64x128xf32>
    %38 = arith.truncf %37 : vector<64x128xf32> to vector<64x128xbf16>
    %c0_21 = arith.constant 0 : index
    %c0_22 = arith.constant 0 : index
    %39 = vector.load %arg8[%c0_21, %c0_22] : memref<64x128xbf16, #tpu.memory_space<vmem>>, vector<64x128xbf16>
    tpu.vector_store %arg8[%c0_21, %c0_22], %38 {strides = array<i32>} : memref<64x128xbf16, #tpu.memory_space<vmem>>, vector<64x128xbf16>,
    return
  }
  func.func @transform_0(%arg0: i32) -> (i32, i32) {
    %c0_i32 = arith.constant 0 : i32
    %c0_i32_0 = arith.constant 0 : i32
    return %arg0, %c0_i32 : i32, i32
  }
  func.func @transform_1(%arg0: i32) -> (i32, i32) {
    %c0_i32 = arith.constant 0 : i32
    %c0_i32_0 = arith.constant 0 : i32
    %c0_i32_1 = arith.constant 0 : i32
    return %c0_i32, %c0_i32_0 : i32, i32
  }
  func.func @transform_2(%arg0: i32) -> (i32, i32) {
    %c0_i32 = arith.constant 0 : i32
    %c0_i32_0 = arith.constant 0 : i32
    %c0_i32_1 = arith.constant 0 : i32
    return %c0_i32, %c0_i32_0 : i32, i32
  }
  func.func @transform_3(%arg0: i32) -> (i32, i32) {
    %c0_i32 = arith.constant 0 : i32
    %c0_i32_0 = arith.constant 0 : i32
    %c0_i32_1 = arith.constant 0 : i32
    return %c0_i32, %c0_i32_0 : i32, i32
  }
  func.func @transform_4(%arg0: i32) -> (i32, i32) {
    %c0_i32 = arith.constant 0 : i32
    %c0_i32_0 = arith.constant 0 : i32
    %c0_i32_1 = arith.constant 0 : i32
    return %c0_i32, %c0_i32_0 : i32, i32
  }
  func.func @transform_5(%arg0: i32) -> (i32, i32) {
    %c0_i32 = arith.constant 0 : i32
    %c0_i32_0 = arith.constant 0 : i32
    %c0_i32_1 = arith.constant 0 : i32
    return %c0_i32, %c0_i32_0 : i32, i32
  }
  func.func @transform_6(%arg0: i32) -> (i32, i32) {
    %c0_i32 = arith.constant 0 : i32
    %c0_i32_0 = arith.constant 0 : i32
    %c0_i32_1 = arith.constant 0 : i32
    return %c0_i32, %c0_i32_0 : i32, i32
  }
  func.func @transform_7(%arg0: i32) -> (i32, i32) {
    %c0_i32 = arith.constant 0 : i32
    %c0_i32_0 = arith.constant 0 : i32
    return %arg0, %c0_i32 : i32, i32
  }
}

</mosaic_0001>

<bundles_post_ra>
// kernel: grade_consistency_head.1
= control target key start
LH: loop header
LB: loop body
LE: loop exit
PB: predicated region body
PF: predicated region fallthrough
CT: control target
= control target key end

     0   :  { %v2253_v1 = vmov 0   ;;  %vm143_vm0 = vcmask 261120   ;;  %v53_v58 = vlaneseq  ;;  %s3058_s1 = inlined_call_operand.vmem [shape: bf16[32,768], index: 1, kind: input, shape index: {}]   ;;  %s3059_s0 = inlined_call_operand.vmem [shape: f32[64,32], index: 0, kind: input, shape index: {}]   ;;  %s3060_s3 = inlined_call_operand.vmem [shape: bf16[512,256], index: 3, kind: input, shape index: {}]   ;;  %s3061_s5 = inlined_call_operand.vmem [shape: bf16[512,128], index: 5, kind: input, shape index: {}]   ;;  %s3062_s2 = inlined_call_operand.vmem [shape: f32[1,768], index: 2, kind: input, shape index: {}]   ;;  %s3063_s4 = inlined_call_operand.vmem [shape: f32[1,256], index: 4, kind: input, shape index: {}]   ;;  %s3064_s6 = inlined_call_operand.vmem [shape: f32[1,128], index: 6, kind: input, shape index: {}]   ;;  %s3065_s7 = inlined_call_operand.vmem [shape: bf16[64,128], index: 7, kind: output, shape index: {}]  }
   0x1   :  { %v1979_v0 = vld [vmem:[%s3058_s1 + $0x4] ss:$24 sps:$4 sm:$0xff]   ;;  %188 = vmatprep.mubr.bf16.mxu0 %v2253_v1  ;;  %261 = vmatprep.mubr.bf16.mxu1 %v2253_v1  ;;  %v1981_v2 = vld [vmem:[%s3058_s1] ss:$24 sps:$4 sm:$0xff]   ;;  %v1982_v3 = vld [vmem:[%s3058_s1 + $0x34] ss:$24 sps:$4 sm:$0xff]  }
   0x2   :  { %156 = vmatprep.subr.bf16.mxu0 %v1979_v0  ;;  %v1984_v4 = vld [vmem:[%s3058_s1 + $0x30] ss:$24 sps:$4 sm:$0xff]   ;;  %v27_v5 = vld [vmem:[%s3059_s0] sm:$0xff]  ;;  %v1988_v10 = vld [vmem:[%s3058_s1 + $0x3c] ss:$24 sps:$4 sm:$0xff]   ;;  %v2491_v59 = vshrl.u32 %v53_v58, 7 }
   0x3   :  { %157 = vmatpush1.bf16.msra.mxu0 %v1981_v2  ;;  %v28_v6 = vld [vmem:[%s3059_s0 + $0x8] sm:$0xff]  ;;  %v1990_v11 = vld [vmem:[%s3058_s1 + $0x38] ss:$24 sps:$4 sm:$0xff]   ;;  %v1996_v17 = vld [vmem:[%s3060_s3 + $0x14] ss:$8 sps:$4 sm:$0xff]  }
   0x4   :  { %158 = vmatprep.subr.bf16.mxu0 %v1982_v3  ;;  %v2314_v7 = vpack.c.bf16 %v28_v6, %v27_v5  ;;  %v1985_v8 = vld [vmem:[%s3058_s1 + $0xc] ss:$24 sps:$4 sm:$0xff]   ;;  %v1987_v9 = vld [vmem:[%s3058_s1 + $0x8] ss:$24 sps:$4 sm:$0xff]   ;;  %v29_v13 = vld [vmem:[%s3059_s0 + $0x10] sm:$0xff]  ;;  %v55_v63 = vsub.s32 0, %v2491_v59 }
   0x5   :  { %229 = vmatprep.subr.bf16.mxu1 %v1985_v8  ;;  %v1993_v12 = vld [vmem:[%s3060_s3 + $0x4] ss:$8 sps:$4 sm:$0xff]   ;;  %v30_v14 = vld [vmem:[%s3059_s0 + $0x18] sm:$0xff]  ;;  %v1991_v15 = vld [vmem:[%s3060_s3] ss:$8 sps:$4 sm:$0xff]   ;;  %v59_v2 = vsub.s32 1, %v2491_v59 }
   0x6   :  { %230 = vmatpush1.bf16.msra.mxu1 %v1987_v9  ;;  %v2343_v16 = vpack.c.bf16 %v30_v14, %v29_v13  ;;  %v1994_v18 = vld [vmem:[%s3060_s3 + $0x10] ss:$8 sps:$4 sm:$0xff]   ;;  %v1999_v19 = vld [vmem:[%s3060_s3 + $0x24] ss:$8 sps:$4 sm:$0xff]   ;;  %v1997_v22 = vld [vmem:[%s3060_s3 + $0x20] ss:$8 sps:$4 sm:$0xff]  }
   0x7   :  { %159 = vmatpush1.bf16.msra.mxu0 %v1984_v4  ;;  %231 = vmatprep.subr.bf16.mxu1 %v1988_v10  ;;  %v31_v20 = vld [vmem:[%s3059_s0 + $0x20] sm:$0xff]  ;;  %v32_v21 = vld [vmem:[%s3059_s0 + $0x28] sm:$0xff]  ;;  %v2002_v23 = vld [vmem:[%s3060_s3 + $0x34] ss:$8 sps:$4 sm:$0xff]   ;;  %v63_v3 = vsub.s32 2, %v2491_v59  ;;  %v67_v8 = vsub.s32 3, %v2491_v59 }
   0x8   :  { %v2372_v24 = vpack.c.bf16 %v32_v21, %v31_v20  ;;  %v2000_v25 = vld [vmem:[%s3060_s3 + $0x30] ss:$8 sps:$4 sm:$0xff]   ;;  %v2005_v26 = vld [vmem:[%s3060_s3 + $0x44] ss:$8 sps:$4 sm:$0xff]   ;;  %v2003_v29 = vld [vmem:[%s3060_s3 + $0x40] ss:$8 sps:$4 sm:$0xff]  }
   0x9   :  { %v33_v27 = vld [vmem:[%s3059_s0 + $0x30] sm:$0xff]  ;;  %v34_v28 = vld [vmem:[%s3059_s0 + $0x38] sm:$0xff]  ;;  %v2011_v33 = vld [vmem:[%s3060_s3 + $0x64] ss:$8 sps:$4 sm:$0xff]  }
   0xa   :  { %1718 = vmatmul.mubr.msk.bf16.vlgmr.msra.gmra.mrb[0].mxu0 %vm143_vm0, %v2314_v7  ;;  %232 = vmatpush1.bf16.msra.mxu1 %v1990_v11  ;;  %v2008_v30 = vld [vmem:[%s3060_s3 + $0x54] ss:$8 sps:$4 sm:$0xff]   ;;  %v2398_v31 = vpack.c.bf16 %v34_v28, %v33_v27  ;;  %v2006_v32 = vld [vmem:[%s3060_s3 + $0x50] ss:$8 sps:$4 sm:$0xff]   ;;  %v2009_v34 = vld [vmem:[%s3060_s3 + $0x60] ss:$8 sps:$4 sm:$0xff]  }
   0xb   :  { %198 = vmatprep.mubr.bf16.mxu0 %v2253_v1  ;;  %1027 = vmatprep.subr.bf16.mxu1 %v1993_v12  ;;  %v2014_v35 = vld [vmem:[%s3060_s3 + $0x74] ss:$8 sps:$4 sm:$0xff]   ;;  %v2012_v36 = vld [vmem:[%s3060_s3 + $0x70] ss:$8 sps:$4 sm:$0xff]   ;;  %v2017_v37 = vld [vmem:[%s3060_s3 + $0x84] ss:$8 sps:$4 sm:$0xff]  }
   0xc   :  { %v2015_v38 = vld [vmem:[%s3060_s3 + $0x80] ss:$8 sps:$4 sm:$0xff]   ;;  %v2020_v39 = vld [vmem:[%s3060_s3 + $0x94] ss:$8 sps:$4 sm:$0xff]   ;;  %v2018_v40 = vld [vmem:[%s3060_s3 + $0x90] ss:$8 sps:$4 sm:$0xff]  }
   0xd   :  { %1722 = vmatmul.mubr.msk.bf16.vlgmr.msra.gmra.mrb[0].mxu1 %vm143_vm0, %v2314_v7  ;;  %v2023_v41 = vld [vmem:[%s3060_s3 + $0xa4] ss:$8 sps:$4 sm:$0xff]   ;;  %v2021_v42 = vld [vmem:[%s3060_s3 + $0xa0] ss:$8 sps:$4 sm:$0xff]   ;;  %v2026_v43 = vld [vmem:[%s3060_s3 + $0xb4] ss:$8 sps:$4 sm:$0xff]  }
   0xe   :  { %271 = vmatprep.mubr.bf16.mxu1 %v2253_v1  ;;  %1028 = vmatpush1.bf16.msra.mxu1 %v1991_v15  ;;  %v2024_v44 = vld [vmem:[%s3060_s3 + $0xb0] ss:$8 sps:$4 sm:$0xff]   ;;  %v2029_v45 = vld [vmem:[%s3060_s3 + $0xc4] ss:$8 sps:$4 sm:$0xff]   ;;  %v2027_v46 = vld [vmem:[%s3060_s3 + $0xc0] ss:$8 sps:$4 sm:$0xff]  }
   0xf   :  { %1029 = vmatprep.subr.bf16.mxu1 %v1996_v17  ;;  %v2032_v47 = vld [vmem:[%s3060_s3 + $0xd4] ss:$8 sps:$4 sm:$0xff]   ;;  %v2030_v48 = vld [vmem:[%s3060_s3 + $0xd0] ss:$8 sps:$4 sm:$0xff]   ;;  %v2035_v49 = vld [vmem:[%s3060_s3 + $0xe4] ss:$8 sps:$4 sm:$0xff]  }
  0x10   :  { %v2033_v50 = vld [vmem:[%s3060_s3 + $0xe0] ss:$8 sps:$4 sm:$0xff]   ;;  %v2038_v51 = vld [vmem:[%s3060_s3 + $0xf4] ss:$8 sps:$4 sm:$0xff]   ;;  %v2036_v52 = vld [vmem:[%s3060_s3 + $0xf0] ss:$8 sps:$4 sm:$0xff]  }
  0x11   :  { %v2041_v53 = vld [vmem:[%s3060_s3 + $0x104] ss:$8 sps:$4 sm:$0xff]   ;;  %v2087_v54 = vld [vmem:[%s3058_s1 + $0x10] ss:$24 sps:$4 sm:$0xff]   ;;  %v2090_v56 = vld [vmem:[%s3058_s1 + $0x40] ss:$24 sps:$4 sm:$0xff]  }
  0x12   :  { %1719 = vmatmul.mubr.msk.bf16.gmra.mrb[4].mxu0 %vm143_vm0, %v2343_v16  ;;  %1030 = vmatpush1.bf16.msra.mxu1 %v1994_v18  ;;  %v2089_v55 = vld [vmem:[%s3058_s1 + $0x14] ss:$24 sps:$4 sm:$0xff]   ;;  %v2092_v57 = vld [vmem:[%s3058_s1 + $0x44] ss:$24 sps:$4 sm:$0xff]  }
  0x13   :  { %208 = vmatprep.mubr.bf16.mxu0 %v2253_v1  ;;  %1031 = vmatprep.subr.bf16.mxu1 %v1999_v19  ;;  %v2093_v60 = vld [vmem:[%s3061_s5 + $0x40] sm:$0xff]   ;;  %v2095_v62 = vld [vmem:[%s3061_s5 + $0x48] sm:$0xff]  }
  0x14   :  { %302 = vmatprep.subr.bf16.mxu0 %v2089_v55  ;;  %v2094_v61 = vld [vmem:[%s3061_s5] sm:$0xff]   ;;  %v2096_v0 = vld [vmem:[%s3061_s5 + $0x8] sm:$0xff]  }
  0x15   :  { %1723 = vmatmul.mubr.msk.bf16.gmra.mrb[4].mxu1 %vm143_vm0, %v2343_v16  ;;  %303 = vmatpush1.bf16.msra.mxu0 %v2087_v54  ;;  %v2512_v4 = vld [vmem:[%s3062_s2] sm:$0x3f] }
  0x16   :  { %281 = vmatprep.mubr.bf16.mxu1 %v2253_v1  ;;  %1032 = vmatpush1.bf16.msra.mxu1 %v1997_v22  ;;  %v2520_v5 = vrot.slane %v2512_v4, %v55_v63  ;;  %v2525_v6 = vrot.slane %v2512_v4, %v59_v2  ;;  %v2534_v15 = vrot.slane %v2512_v4, %v63_v3 }
  0x17   :  { %1033 = vmatprep.subr.bf16.mxu1 %v2002_v23  ;;  %304 = vmatprep.subr.bf16.mxu0 %v2092_v57  ;;  %v2538_v18 = vrot.slane %v2512_v4, %v67_v8 }
  0x19   :  { %305 = vmatpush1.bf16.msra.mxu0 %v2090_v56 }
  0x1a   :  { %1720 = vmatmul.mubr.msk.bf16.gmra.mrb[8].mxu0 %vm143_vm0, %v2372_v24  ;;  %1034 = vmatpush1.bf16.msra.mxu1 %v2000_v25 }
  0x1b   :  { %218 = vmatprep.mubr.bf16.mxu0 %v2253_v1  ;;  %1035 = vmatprep.subr.bf16.mxu1 %v2005_v26 }
  0x1c   :  { %1866 = vmatprep.subr.bf16.mxu0 %v2093_v60 }
  0x1d   :  { %1724 = vmatmul.mubr.msk.bf16.gmra.mrb[8].mxu1 %vm143_vm0, %v2372_v24 }
  0x1e   :  { %291 = vmatprep.mubr.bf16.mxu1 %v2253_v1  ;;  %1036 = vmatpush1.bf16.msra.mxu1 %v2003_v29 }
  0x1f   :  { %1037 = vmatprep.subr.bf16.mxu1 %v2008_v30 }
  0x22   :  { %1721 = vmatmul.mubr.msk.bf16.gmra.mrb[12].mxu0 %vm143_vm0, %v2398_v31  ;;  %1038 = vmatpush1.bf16.msra.mxu1 %v2006_v32 }
  0x23   :  { %334 = vmatprep.mubr.bf16.mxu0 %v2253_v1  ;;  %1039 = vmatprep.subr.bf16.mxu1 %v2011_v33 }
  0x25   :  { %1725 = vmatmul.mubr.msk.bf16.gmra.mrb[12].mxu1 %vm143_vm0, %v2398_v31 }
  0x26   :  { %1040 = vmatpush1.bf16.msra.mxu1 %v2009_v34 }
  0x27   :  { %1041 = vmatprep.subr.bf16.mxu1 %v2014_v35 }
  0x2a   :  { %1042 = vmatpush1.bf16.msra.mxu1 %v2012_v36  ;;  %1726 = vmatmul.mubr.msk.bf16.vlgmr.msra.gmra.mrb[16].mxu0 %vm143_vm0, %v2314_v7 }
  0x2b   :  { %1043 = vmatprep.subr.bf16.mxu1 %v2017_v37  ;;  %344 = vmatprep.mubr.bf16.mxu0 %v2253_v1 }
  0x2c   :  { %1867 = vmatpush3.bf16.msra.mxu0 %v2094_v61 }
  0x2d   :  { %1868 = vmatprep.subr.bf16.mxu0 %v2095_v62 }
  0x2e   :  { %1044 = vmatpush1.bf16.msra.mxu1 %v2015_v38 }
  0x2f   :  { %1045 = vmatprep.subr.bf16.mxu1 %v2020_v39 }
  0x30   :  { %1869 = vmatpush3.bf16.msra.mxu0 %v2096_v0 }
  0x32   :  { %1046 = vmatpush1.bf16.msra.mxu1 %v2018_v40  ;;  %1727 = vmatmul.mubr.msk.bf16.gmra.mrb[20].mxu0 %vm143_vm0, %v2343_v16 }
  0x33   :  { %1047 = vmatprep.subr.bf16.mxu1 %v2023_v41  ;;  %354 = vmatprep.mubr.bf16.mxu0 %v2253_v1 }
  0x36   :  { %1048 = vmatpush1.bf16.msra.mxu1 %v2021_v42 }
  0x37   :  { %1049 = vmatprep.subr.bf16.mxu1 %v2026_v43 }
  0x3a   :  { %1050 = vmatpush1.bf16.msra.mxu1 %v2024_v44  ;;  %1728 = vmatmul.mubr.msk.bf16.gmra.mrb[24].mxu0 %vm143_vm0, %v2372_v24 }
  0x3b   :  { %1051 = vmatprep.subr.bf16.mxu1 %v2029_v45  ;;  %364 = vmatprep.mubr.bf16.mxu0 %v2253_v1 }
  0x3e   :  { %1052 = vmatpush1.bf16.msra.mxu1 %v2027_v46 }
  0x3f   :  { %1053 = vmatprep.subr.bf16.mxu1 %v2032_v47 }
  0x42   :  { %1054 = vmatpush1.bf16.msra.mxu1 %v2030_v48  ;;  %1729 = vmatmul.mubr.msk.bf16.gmra.mrb[28].mxu0 %vm143_vm0, %v2398_v31 }
  0x43   :  { %1055 = vmatprep.subr.bf16.mxu1 %v2035_v49 }
  0x46   :  { %1056 = vmatpush1.bf16.msra.mxu1 %v2033_v50 }
  0x47   :  { %1057 = vmatprep.subr.bf16.mxu1 %v2038_v51 }
  0x4a   :  { %1058 = vmatpush1.bf16.msra.mxu1 %v2036_v52 }
  0x4b   :  { %1100 = vmatprep.subr.bf16.mxu1 %v2041_v53 }
  0xdd   :  { %v190_v7 = vpop.f32.mrb[0].mxu0 }
  0xde   :  { %v191_v9 = vadd.f32 %v190_v7, %v2520_v5  ;;  %v192_v10 = vpop.f32.mrb[1].mxu0 }
  0xdf   :  { %v193_v1 = vadd.f32 %v192_v10, %v2525_v6  ;;  %v194_v11 = vpop.f32.mrb[2].mxu0 }
  0xe0   :  { %v423_v12 = vmul.f32 0.70710677, %v191_v9  ;;  %v195_v13 = vadd.f32 %v194_v11, %v2520_v5  ;;  %v196_v14 = vpop.f32.mrb[3].mxu0  ;;  %v263_v21 = vpop.f32.mrb[0].mxu1  ;;  %v375_v27 = vmul.f32 0.5, %v191_v9 }
  0xe1   :  { %v424_v16 = vmul.f32 0.70710677, %v193_v1  ;;  %v197_v17 = vadd.f32 %v196_v14, %v2525_v6  ;;  %v264_v22 = vadd.f32 %v263_v21, %v2534_v15  ;;  %v265_v23 = vpop.f32.mrb[1].mxu1  ;;  %v376_v32 = vmul.f32 0.5, %v193_v1 }
  0xe2   :  { %2125 = verf.f32 %v423_v12  ;;  %v429_v19 = vmul.f32 0.70710677, %v195_v13  ;;  %v266_v25 = vadd.f32 %v265_v23, %v2538_v18  ;;  %v267_v26 = vpop.f32.mrb[2].mxu1  ;;  %v381_v41 = vmul.f32 0.5, %v195_v13 }
  0xe3   :  { %2127 = verf.f32 %v424_v16  ;;  %v430_v20 = vmul.f32 0.70710677, %v197_v17  ;;  %v425_v30 = vmul.f32 0.70710677, %v264_v22  ;;  %v269_v31 = vpop.f32.mrb[3].mxu1  ;;  %v268_v36 = vadd.f32 %v267_v26, %v2534_v15 }
  0xe4   :  { %2129 = verf.f32 %v429_v19  ;;  %v426_v35 = vmul.f32 0.70710677, %v266_v25  ;;  %v270_v40 = vadd.f32 %v269_v31, %v2538_v18  ;;  %v382_v44 = vmul.f32 0.5, %v197_v17 }
  0xe5   :  { %2131 = verf.f32 %v430_v20  ;;  %v200_v24 = vpop.f32.mrb[4].mxu0  ;;  %v2548_v46 = vmul.f32 0.5, %v264_v22  ;;  %v2550_v48 = vmul.f32 0.5, %v266_v25  ;;  %v431_v49 = vmul.f32 0.70710677, %v268_v36 }
  0xe6   :  { %v201_v28 = vadd.f32 %v200_v24, %v2520_v5  ;;  %v202_v29 = vpop.f32.mrb[5].mxu0  ;;  %2133 = verf.f32 %v425_v30  ;;  %v432_v53 = vmul.f32 0.70710677, %v270_v40  ;;  %v2566_v17 = vmul.f32 0.5, %v268_v36  ;;  %v2039_v25 = vld [vmem:[%s3060_s3 + $0x100] ss:$8 sps:$4 sm:$0xff]  }
  0xe7   :  { %v203_v33 = vadd.f32 %v202_v29, %v2525_v6  ;;  %v204_v34 = vpop.f32.mrb[6].mxu0  ;;  %2135 = verf.f32 %v426_v35  ;;  %v2584_v36 = vmul.f32 0.5, %v270_v40  ;;  %v2042_v40 = vld [vmem:[%s3060_s3 + $0x110] ss:$8 sps:$4 sm:$0xff]  }
  0xe8   :  { %v435_v37 = vmul.f32 0.70710677, %v201_v28  ;;  %v205_v38 = vadd.f32 %v204_v34, %v2520_v5  ;;  %v206_v39 = vpop.f32.mrb[7].mxu0  ;;  %v273_v50 = vpop.f32.mrb[4].mxu1  ;;  %v2552_v52 = vmul.f32 0.5, %v201_v28 }
  0xe9   :  { %v436_v42 = vmul.f32 0.70710677, %v203_v33  ;;  %v207_v43 = vadd.f32 %v206_v39, %v2525_v6  ;;  %v2554_v54 = vpop.f32.mrb[5].mxu1  ;;  %v2556_v57 = vmul.f32 0.5, %v203_v33 }
  0xea   :  { %2137 = verf.f32 %v435_v37  ;;  %v441_v45 = vmul.f32 0.70710677, %v205_v38  ;;  %v2558_v60 = vpop.f32.mrb[6].mxu1  ;;  %v2560_v0 = vmul.f32 0.5, %v205_v38  ;;  %v2587_v37 = vadd.f32 %v273_v50, %v2534_v15 }
  0xeb   :  { %2139 = verf.f32 %v436_v42  ;;  %v442_v47 = vmul.f32 0.70710677, %v207_v43  ;;  %v2563_v8 = vpop.f32.mrb[7].mxu1  ;;  %v394_v29 = vmul.f32 0.5, %v207_v43 }
  0xec   :  { %v2126_v51 = vpop.eup %2125  ;;  %2141 = verf.f32 %v441_v45 }
  0xed   :  { %v2128_v55 = vpop.eup %2127  ;;  %v519_v56 = vadd.f32 1.0, %v2126_v51  ;;  %2143 = verf.f32 %v442_v47  ;;  %v210_v58 = vpop.f32.mrb[8].mxu0 }
  0xee   :  { %v2130_v61 = vpop.eup %2129  ;;  %v520_v62 = vadd.f32 1.0, %v2128_v55  ;;  %v211_v3 = vadd.f32 %v210_v58, %v2520_v5  ;;  %v212_v7 = vpop.f32.mrb[9].mxu0  ;;  %2145 = verf.f32 %v431_v49 }
  0xef   :  { %v2132_v9 = vpop.eup %2131  ;;  %v525_v10 = vadd.f32 1.0, %v2130_v61  ;;  %v213_v1 = vadd.f32 %v212_v7, %v2525_v6  ;;  %v214_v11 = vpop.f32.mrb[10].mxu0  ;;  %v567_v12 = vmul.f32 %v519_v56, %v375_v27  ;;  %2147 = verf.f32 %v432_v53 }
  0xf0   :  { %v526_v13 = vadd.f32 1.0, %v2132_v9  ;;  %v447_v14 = vmul.f32 0.70710677, %v211_v3  ;;  %v216_v16 = vpop.f32.mrb[11].mxu0  ;;  %v2569_v21 = vadd.f32 %v214_v11, %v2520_v5  ;;  %v2134_v22 = vpop.eup %2133  ;;  %v568_v23 = vmul.f32 %v520_v62, %v376_v32  ;;  %v2044_v32 = vld [vmem:[%s3060_s3 + $0x114] ss:$8 sps:$4 sm:$0xff]  }
  0xf1   :  { %v573_v19 = vmul.f32 %v525_v10, %v381_v41  ;;  %v448_v20 = vmul.f32 0.70710677, %v213_v1  ;;  %v2575_v26 = vadd.f32 %v216_v16, %v2525_v6  ;;  %v2136_v27 = vpop.eup %2135  ;;  %v2578_v31 = vpop.f32.mrb[8].mxu1  ;;  %v2591_v42 = vmul.f32 0.5, %v211_v3 }
  0xf2   :  { %v574_v24 = vmul.f32 %v526_v13, %v382_v44  ;;  %2149 = verf.f32 %v447_v14  ;;  %v453_v30 = vmul.f32 0.70710677, %v2569_v21  ;;  %v2589_v38 = vpop.f32.mrb[9].mxu1  ;;  %v521_v44 = vadd.f32 1.0, %v2134_v22  ;;  %v2047_v14 = vld [vmem:[%s3060_s3 + $0x124] ss:$8 sps:$4 sm:$0xff]  }
  0xf3   :  { %v615_v28 = vpack.c.bf16 %v573_v19, %v567_v12  ;;  %2151 = verf.f32 %v448_v20  ;;  %v454_v35 = vmul.f32 0.70710677, %v2575_v26  ;;  %v2593_v45 = vpop.f32.mrb[10].mxu1  ;;  %v2598_v50 = vmul.f32 0.5, %v213_v1 }
  0xf4   :  { %v2138_v33 = vpop.eup %2137  ;;  %v616_v34 = vpack.c.bf16 %v574_v24, %v568_v23  ;;  %2153 = verf.f32 %v453_v30  ;;  %v2601_v55 = vpop.f32.mrb[11].mxu1  ;;  %v2609_v7 = vadd.f32 %v2554_v54, %v2538_v18  ;;  %v437_v13 = vmul.f32 0.70710677, %v2587_v37 }
  0xf5   :  { %v2140_v39 = vpop.eup %2139  ;;  %v531_v41 = vadd.f32 1.0, %v2138_v33  ;;  %v220_v43 = vpop.f32.mrb[12].mxu0  ;;  %2155 = verf.f32 %v454_v35  ;;  %v2620_v19 = vmul.f32 %v521_v44, %v2548_v46  ;;  %v405_v46 = vmul.f32 0.5, %v2569_v21 }
  0xf6   :  { %v2142_v47 = vpop.eup %2141  ;;  %v532_v49 = vadd.f32 1.0, %v2140_v39  ;;  %1059 = vmatprep.mubr.bf16.mxu1 %v616_v34  ;;  %v221_v51 = vadd.f32 %v220_v43, %v2520_v5  ;;  %v222_v53 = vpop.f32.mrb[13].mxu0  ;;  %v406_v39 = vmul.f32 0.5, %v2575_v26  ;;  %v438_v21 = vmul.f32 0.70710677, %v2609_v7 }
  0xf7   :  { %v2144_v56 = vpop.eup %2143  ;;  %v579_v58 = vmul.f32 %v531_v41, %v2552_v52  ;;  %v537_v61 = vadd.f32 1.0, %v2142_v47  ;;  %1060 = vmatmul.mubr.bf16.vlgmr.msra.gmra.mrb[16].mxu1 %v615_v28  ;;  %v2605_v62 = vadd.f32 %v222_v53, %v2525_v6  ;;  %v224_v3 = vpop.f32.mrb[14].mxu0  ;;  %v2655_v53 = vadd.f32 %v2563_v8, %v2538_v18 }
  0xf8   :  { %v2146_v9 = vpop.eup %2145  ;;  %v580_v10 = vmul.f32 %v532_v49, %v2556_v57  ;;  %v538_v1 = vadd.f32 1.0, %v2144_v56  ;;  %1101 = vmatpush1.bf16.msra.mxu1 %v2039_v25  ;;  %v459_v11 = vmul.f32 0.70710677, %v221_v51  ;;  %v226_v12 = vpop.f32.mrb[15].mxu0  ;;  %v225_v54 = vadd.f32 %v224_v3, %v2520_v5 }
  0xf9   :  { %v585_v52 = vmul.f32 %v537_v61, %v2560_v0  ;;  %1102 = vmatprep.subr.bf16.mxu1 %v2044_v32  ;;  %v460_v16 = vmul.f32 0.70710677, %v2605_v62  ;;  %v2623_v20 = vadd.f32 %v226_v12, %v2525_v6  ;;  %v527_v22 = vadd.f32 1.0, %v2146_v9  ;;  %v2148_v23 = vpop.eup %2147  ;;  %v2045_v0 = vld [vmem:[%s3060_s3 + $0x120] ss:$8 sps:$4 sm:$0xff]   ;;  %v293_v30 = vpop.f32.mrb[12].mxu1 }
  0xfa   :  { %v586_v57 = vmul.f32 %v538_v1, %v394_v29  ;;  %2157 = verf.f32 %v459_v11  ;;  %v465_v24 = vmul.f32 0.70710677, %v225_v54  ;;  %v522_v25 = vadd.f32 1.0, %v2136_v27  ;;  %v2050_v6 = vld [vmem:[%s3060_s3 + $0x134] ss:$8 sps:$4 sm:$0xff]   ;;  %v2636_v32 = vpop.f32.mrb[13].mxu1 }
  0xfb   :  { %2159 = verf.f32 %v460_v16  ;;  %v619_v28 = vpack.c.bf16 %v585_v52, %v579_v58  ;;  %v466_v29 = vmul.f32 0.70710677, %v2623_v20  ;;  %v2634_v34 = vmul.f32 %v527_v22, %v2566_v17  ;;  %v2640_v41 = vpop.f32.mrb[14].mxu1 }
  0xfc   :  { %v2150_v5 = vpop.eup %2149  ;;  %1103 = vmatpush1.bf16.msra.mxu1 %v2042_v40  ;;  %v620_v33 = vpack.c.bf16 %v586_v57, %v580_v10  ;;  %2161 = verf.f32 %v465_v24  ;;  %v2646_v17 = vadd.f32 %v2558_v60, %v2534_v15  ;;  %v2648_v47 = vpop.f32.mrb[15].mxu1  ;;  %v411_v26 = vmul.f32 0.5, %v221_v51  ;;  %v2048_v60 = vld [vmem:[%s3060_s3 + $0x130] ss:$8 sps:$4 sm:$0xff]  }
  0xfd   :  { %v2152_v35 = vpop.eup %2151  ;;  %v543_v27 = vadd.f32 1.0, %v2150_v5  ;;  %1104 = vmatprep.subr.bf16.mxu1 %v2047_v14  ;;  %2163 = verf.f32 %v466_v29  ;;  %v617_v44 = vpack.c.bf16 %v2634_v34, %v2620_v19  ;;  %v2651_v40 = vmul.f32 %v522_v25, %v2550_v48  ;;  %v2053_v48 = vld [vmem:[%s3060_s3 + $0x144] ss:$8 sps:$4 sm:$0xff]   ;;  %v2099_v19 = vld [vmem:[%s3061_s5 + $0x58] sm:$0xff]  }
  0xfe   :  { %v544_v43 = vadd.f32 1.0, %v2152_v35  ;;  %1069 = vmatprep.mubr.bf16.mxu1 %v620_v33  ;;  %v2154_v49 = vpop.eup %2153  ;;  %2165 = verf.f32 %v437_v13  ;;  %v528_v51 = vadd.f32 1.0, %v2148_v23  ;;  %v443_v8 = vmul.f32 0.70710677, %v2646_v17  ;;  %v2100_v34 = vld [vmem:[%s3061_s5 + $0x18] sm:$0xff]  }
  0xff   :  { %1070 = vmatmul.mubr.bf16.gmra.mrb[20].mxu1 %v619_v28  ;;  %v2156_v56 = vpop.eup %2155  ;;  %v591_v58 = vmul.f32 %v543_v27, %v2591_v42  ;;  %v549_v61 = vadd.f32 1.0, %v2154_v49  ;;  %2167 = verf.f32 %v438_v21  ;;  %v444_v42 = vmul.f32 0.70710677, %v2655_v53 }
 0x100   :  { %1105 = vmatpush1.bf16.msra.mxu1 %v2045_v0  ;;  %v592_v3 = vmul.f32 %v544_v43, %v2598_v50  ;;  %v550_v9 = vadd.f32 1.0, %v2156_v56  ;;  %v2669_v1 = vadd.f32 %v2578_v31, %v2534_v15  ;;  %v2673_v11 = vadd.f32 %v2589_v38, %v2538_v18  ;;  %v2051_v38 = vld [vmem:[%s3060_s3 + $0x140] ss:$8 sps:$4 sm:$0xff]  }
 0x101   :  { %1106 = vmatprep.subr.bf16.mxu1 %v2050_v6  ;;  %v597_v10 = vmul.f32 %v549_v61, %v405_v46  ;;  %v2677_v12 = vadd.f32 %v2593_v45, %v2534_v15  ;;  %v412_v13 = vmul.f32 0.5, %v2605_v62  ;;  %2169 = verf.f32 %v443_v8  ;;  %v2056_v62 = vld [vmem:[%s3060_s3 + $0x154] ss:$8 sps:$4 sm:$0xff]  }
 0x102   :  { %v598_v50 = vmul.f32 %v550_v9, %v406_v39  ;;  %v2682_v52 = vadd.f32 %v2601_v55, %v2538_v18  ;;  %v417_v31 = vmul.f32 0.5, %v225_v54  ;;  %2171 = verf.f32 %v444_v42 }
 0x103   :  { %v623_v16 = vpack.c.bf16 %v597_v10, %v591_v58  ;;  %v449_v45 = vmul.f32 0.70710677, %v2669_v1  ;;  %v450_v23 = vmul.f32 0.70710677, %v2673_v11  ;;  %v2693_v54 = vadd.f32 %v293_v30, %v2534_v15 }
 0x104   :  { %v2158_v14 = vpop.eup %2157  ;;  %1107 = vmatpush1.bf16.msra.mxu1 %v2048_v60  ;;  %v624_v55 = vpack.c.bf16 %v598_v50, %v592_v3  ;;  %v2696_v24 = vmul.f32 %v528_v51, %v2584_v36  ;;  %v455_v25 = vmul.f32 0.70710677, %v2677_v12  ;;  %v418_v5 = vmul.f32 0.5, %v2623_v20  ;;  %v2054_v36 = vld [vmem:[%s3060_s3 + $0x150] ss:$8 sps:$4 sm:$0xff]  }
 0x105   :  { %v2160_v57 = vpop.eup %2159  ;;  %v555_v22 = vadd.f32 1.0, %v2158_v14  ;;  %1108 = vmatprep.subr.bf16.mxu1 %v2053_v48  ;;  %2173 = verf.f32 %v449_v45  ;;  %v389_v46 = vmul.f32 0.5, %v2587_v37  ;;  %v456_v6 = vmul.f32 0.70710677, %v2682_v52  ;;  %v2059_v37 = vld [vmem:[%s3060_s3 + $0x164] ss:$8 sps:$4 sm:$0xff]  }
 0x106   :  { %v556_v0 = vadd.f32 1.0, %v2160_v57  ;;  %v2162_v28 = vpop.eup %2161  ;;  %1079 = vmatprep.mubr.bf16.mxu1 %v624_v55  ;;  %2175 = verf.f32 %v450_v23  ;;  %v461_v20 = vmul.f32 0.70710677, %v2693_v54  ;;  %v2711_v21 = vadd.f32 %v2636_v32, %v2538_v18  ;;  %v2057_v32 = vld [vmem:[%s3060_s3 + $0x160] ss:$8 sps:$4 sm:$0xff]  }
 0x107   :  { %v2164_v29 = vpop.eup %2163  ;;  %v603_v33 = vmul.f32 %v555_v22, %v411_v26  ;;  %v561_v35 = vadd.f32 1.0, %v2162_v28  ;;  %2177 = verf.f32 %v455_v25  ;;  %1080 = vmatmul.mubr.bf16.gmra.mrb[24].mxu1 %v623_v16  ;;  %v618_v56 = vpack.c.bf16 %v2696_v24, %v2651_v40  ;;  %v2060_v16 = vld [vmem:[%s3060_s3 + $0x170] ss:$8 sps:$4 sm:$0xff]  }
 0x108   :  { %v604_v30 = vmul.f32 %v556_v0, %v412_v13  ;;  %1109 = vmatpush1.bf16.msra.mxu1 %v2051_v38  ;;  %v2166_v27 = vpop.eup %2165  ;;  %v562_v39 = vadd.f32 1.0, %v2164_v29  ;;  %2179 = verf.f32 %v456_v6  ;;  %v2717_v58 = vadd.f32 %v2640_v41, %v2534_v15  ;;  %v2062_v15 = vld [vmem:[%s3060_s3 + $0x174] ss:$8 sps:$4 sm:$0xff]  }
 0x109   :  { %1110 = vmatprep.subr.bf16.mxu1 %v2056_v62  ;;  %v2168_v43 = vpop.eup %2167  ;;  %v609_v49 = vmul.f32 %v561_v35, %v417_v31  ;;  %v533_v26 = vadd.f32 1.0, %v2166_v27  ;;  %v390_v60 = vmul.f32 0.5, %v2609_v7  ;;  %2181 = verf.f32 %v461_v20 }
 0x10a   :  { %v610_v61 = vmul.f32 %v562_v39, %v418_v5  ;;  %v534_v48 = vadd.f32 1.0, %v2168_v43  ;;  %v395_v51 = vmul.f32 0.5, %v2646_v17  ;;  %v462_v9 = vmul.f32 0.70710677, %v2711_v21 }
 0x10b   :  { %v627_v3 = vpack.c.bf16 %v609_v49, %v603_v33  ;;  %v2170_v40 = vpop.eup %2169  ;;  %v396_v7 = vmul.f32 0.5, %v2655_v53  ;;  %v467_v8 = vmul.f32 0.70710677, %v2717_v58  ;;  %v300_v42 = vadd.f32 %v2648_v47, %v2538_v18 }
 0x10c   :  { %1111 = vmatpush1.bf16.msra.mxu1 %v2054_v36  ;;  %v628_v41 = vpack.c.bf16 %v610_v61, %v604_v30  ;;  %v2172_v10 = vpop.eup %2171  ;;  %v2732_v50 = vmul.f32 %v533_v26, %v389_v46  ;;  %v539_v17 = vadd.f32 1.0, %v2170_v40  ;;  %v401_v13 = vmul.f32 0.5, %v2669_v1  ;;  %v2065_v1 = vld [vmem:[%s3060_s3 + $0x184] ss:$8 sps:$4 sm:$0xff]  }
 0x10d   :  { %1112 = vmatprep.subr.bf16.mxu1 %v2059_v37  ;;  %2183 = verf.f32 %v462_v9  ;;  %v2735_v14 = vmul.f32 %v534_v48, %v390_v60  ;;  %v540_v31 = vadd.f32 1.0, %v2172_v10  ;;  %v468_v38 = vmul.f32 0.70710677, %v300_v42  ;;  %v2066_v37 = vld [vmem:[%s3060_s3 + $0x190] ss:$8 sps:$4 sm:$0xff]  }
 0x10e   :  { %1089 = vmatprep.mubr.bf16.mxu1 %v628_v41  ;;  %2185 = verf.f32 %v467_v8  ;;  %v2740_v18 = vmul.f32 %v539_v17, %v395_v51  ;;  %v402_v47 = vmul.f32 0.5, %v2673_v11  ;;  %v407_v62 = vmul.f32 0.5, %v2677_v12  ;;  %v2063_v12 = vld [vmem:[%s3060_s3 + $0x180] ss:$8 sps:$4 sm:$0xff]   ;;  %v2074_v9 = vld [vmem:[%s3060_s3 + $0x1b4] ss:$8 sps:$4 sm:$0xff]  }
 0x10f   :  { %v2174_v53 = vpop.eup %2173  ;;  %v2746_v57 = vmul.f32 %v540_v31, %v396_v7  ;;  %1090 = vmatmul.mubr.bf16.gmra.mrb[28].mxu1 %v627_v3  ;;  %2187 = verf.f32 %v468_v38  ;;  %v408_v0 = vmul.f32 0.5, %v2682_v52  ;;  %v2068_v52 = vld [vmem:[%s3060_s3 + $0x194] ss:$8 sps:$4 sm:$0xff]   ;;  %v413_v35 = vmul.f32 0.5, %v2693_v54  ;;  %v2071_v54 = vld [vmem:[%s3060_s3 + $0x1a4] ss:$8 sps:$4 sm:$0xff]  }
 0x110   :  { %1113 = vmatpush1.bf16.msra.mxu1 %v2057_v32  ;;  %v2176_v45 = vpop.eup %2175  ;;  %v545_v22 = vadd.f32 1.0, %v2174_v53  ;;  %1132 = vmatprep.mubr.bf16.mxu1 %v618_v56  ;;  %v621_v11 = vpack.c.bf16 %v2740_v18, %v2732_v50  ;;  %v414_v20 = vmul.f32 0.5, %v2711_v21  ;;  %v419_v43 = vmul.f32 0.5, %v2717_v58  ;;  %v2069_v51 = vld [vmem:[%s3060_s3 + $0x1a0] ss:$8 sps:$4 sm:$0xff]   ;;  %v2097_v38 = vld [vmem:[%s3061_s5 + $0x50] sm:$0xff]  }
 0x111   :  { %1114 = vmatprep.subr.bf16.mxu1 %v2062_v15  ;;  %v2178_v55 = vpop.eup %2177  ;;  %v546_v23 = vadd.f32 1.0, %v2176_v45  ;;  %v622_v5 = vpack.c.bf16 %v2746_v57, %v2735_v14  ;;  %v420_v48 = vmul.f32 0.5, %v300_v42  ;;  %v2072_v7 = vld [vmem:[%s3060_s3 + $0x1b0] ss:$8 sps:$4 sm:$0xff]   ;;  %v2077_v8 = vld [vmem:[%s3060_s3 + $0x1c4] ss:$8 sps:$4 sm:$0xff]   ;;  %1870 = vmatprep.subr.bf16.mxu0 %v2097_v38 }
 0x112   :  { %v2180_v24 = vpop.eup %2179  ;;  %v2752_v25 = vmul.f32 %v545_v22, %v401_v13  ;;  %v551_v28 = vadd.f32 1.0, %v2178_v55  ;;  %v2075_v42 = vld [vmem:[%s3060_s3 + $0x1c0] ss:$8 sps:$4 sm:$0xff]   ;;  %v2080_v10 = vld [vmem:[%s3060_s3 + $0x1d4] ss:$8 sps:$4 sm:$0xff]   ;;  %v71_v45 = vsub.s32 4, %v2491_v59 }
 0x113   :  { %v594_v46 = vmul.f32 %v546_v23, %v402_v47  ;;  %v552_v6 = vadd.f32 1.0, %v2180_v24  ;;  %v2182_v29 = vpop.eup %2181  ;;  %v2078_v50 = vld [vmem:[%s3060_s3 + $0x1d0] ss:$8 sps:$4 sm:$0xff]   ;;  %v2083_v17 = vld [vmem:[%s3060_s3 + $0x1e4] ss:$8 sps:$4 sm:$0xff]   ;;  %v75_v57 = vsub.s32 5, %v2491_v59 }
 0x114   :  { %1115 = vmatpush1.bf16.msra.mxu1 %v2060_v16  ;;  %v599_v33 = vmul.f32 %v551_v28, %v407_v62  ;;  %v557_v36 = vadd.f32 1.0, %v2182_v29  ;;  %v2081_v13 = vld [vmem:[%s3060_s3 + $0x1e0] ss:$8 sps:$4 sm:$0xff]   ;;  %v2086_v14 = vld [vmem:[%s3060_s3 + $0x1f4] ss:$8 sps:$4 sm:$0xff]   ;;  %v2838_v55 = vrot.slane %v2512_v4, %v71_v45 }
 0x115   :  { %1116 = vmatprep.subr.bf16.mxu1 %v2065_v1  ;;  %v600_v30 = vmul.f32 %v552_v6, %v408_v0  ;;  %v2084_v31 = vld [vmem:[%s3060_s3 + $0x1f0] ss:$8 sps:$4 sm:$0xff]   ;;  %v2102_v16 = vld [vmem:[%s3061_s5 + $0x20] sm:$0xff]   ;;  %v2103_v18 = vld [vmem:[%s3061_s5 + $0x68] sm:$0xff]   ;;  %v336_v1 = vpop.f32.mrb[16].mxu0  ;;  %v2841_v23 = vrot.slane %v2512_v4, %v75_v57 }
 0x116   :  { %v625_v27 = vpack.c.bf16 %v599_v33, %v2752_v25  ;;  %v605_v61 = vmul.f32 %v557_v36, %v413_v35  ;;  %v2098_v53 = vld [vmem:[%s3061_s5 + $0x10] sm:$0xff]   ;;  %v2104_v47 = vld [vmem:[%s3061_s5 + $0x28] sm:$0xff]   ;;  %v338_v62 = vpop.f32.mrb[17].mxu0  ;;  %v337_v24 = vadd.f32 %v336_v1, %v2838_v55  ;;  %v2107_v4 = vld [vmem:[%s3061_s5 + $0x78] sm:$0xff]  }
 0x117   :  { %v2184_v39 = vpop.eup %2183  ;;  %v626_v49 = vpack.c.bf16 %v600_v30, %v594_v46  ;;  %1871 = vmatpush3.bf16.msra.mxu0 %v2098_v53  ;;  %v2105_v22 = vld [vmem:[%s3061_s5 + $0x70] sm:$0xff]   ;;  %v340_v0 = vpop.f32.mrb[18].mxu0  ;;  %v339_v25 = vadd.f32 %v338_v62, %v2841_v23  ;;  %v2108_v33 = vld [vmem:[%s3061_s5 + $0x38] sm:$0xff]   ;;  %v2109_v35 = vld [vmem:[%s3061_s5 + $0xc0] sm:$0xff]  }
 0x118   :  { %1117 = vmatpush1.bf16.msra.mxu1 %v2063_v12  ;;  %v2186_v26 = vpop.eup %2185  ;;  %v558_v56 = vadd.f32 1.0, %v2184_v39  ;;  %1872 = vmatprep.subr.bf16.mxu0 %v2099_v19  ;;  %v341_v28 = vadd.f32 %v340_v0, %v2838_v55  ;;  %v427_v46 = vmul.f32 0.70710677, %v337_v24 }
 0x119   :  { %1118 = vmatprep.subr.bf16.mxu1 %v2068_v52  ;;  %v563_v60 = vadd.f32 1.0, %v2186_v26  ;;  %v2188_v32 = vpop.eup %2187  ;;  %v428_v6 = vmul.f32 0.70710677, %v339_v25 }
 0x11a   :  { %v606_v21 = vmul.f32 %v558_v56, %v414_v20  ;;  %v564_v58 = vadd.f32 1.0, %v2188_v32  ;;  %v433_v29 = vmul.f32 0.70710677, %v341_v28  ;;  %2189 = verf.f32 %v427_v46 }
 0x11b   :  { %v611_v3 = vmul.f32 %v563_v60, %v419_v43  ;;  %1873 = vmatpush3.bf16.msra.mxu0 %v2100_v34  ;;  %2191 = verf.f32 %v428_v6  ;;  %v379_v60 = vmul.f32 0.5, %v337_v24 }
 0x11c   :  { %1119 = vmatpush1.bf16.msra.mxu1 %v2066_v37  ;;  %v612_v40 = vmul.f32 %v564_v58, %v420_v48  ;;  %2193 = verf.f32 %v433_v29 }
 0x11d   :  { %1120 = vmatprep.subr.bf16.mxu1 %v2071_v54  ;;  %v629_v15 = vpack.c.bf16 %v611_v3, %v605_v61 }
 0x11e   :  { %v630_v41 = vpack.c.bf16 %v612_v40, %v606_v21 }
 0x120   :  { %1121 = vmatpush1.bf16.msra.mxu1 %v2069_v51  ;;  %v380_v51 = vmul.f32 0.5, %v339_v25 }
 0x121   :  { %1122 = vmatprep.subr.bf16.mxu1 %v2074_v9  ;;  %v385_v9 = vmul.f32 0.5, %v341_v28 }
 0x124   :  { %1123 = vmatpush1.bf16.msra.mxu1 %v2072_v7  ;;  %v2190_v32 = vpop.eup %2189 }
 0x125   :  { %1124 = vmatprep.subr.bf16.mxu1 %v2077_v8  ;;  %v2192_v3 = vpop.eup %2191  ;;  %v523_v58 = vadd.f32 1.0, %v2190_v32 }
 0x126   :  { %v524_v7 = vadd.f32 1.0, %v2192_v3 }
 0x128   :  { %1125 = vmatpush1.bf16.msra.mxu1 %v2075_v42 }
 0x129   :  { %1126 = vmatprep.subr.bf16.mxu1 %v2080_v10  ;;  %v2863_v10 = vmul.f32 %v523_v58, %v379_v60 }
 0x12c   :  { %1127 = vmatpush1.bf16.msra.mxu1 %v2078_v50 }
 0x12d   :  { %1128 = vmatprep.subr.bf16.mxu1 %v2083_v17 }
 0x130   :  { %1129 = vmatpush1.bf16.msra.mxu1 %v2081_v13 }
 0x131   :  { %1130 = vmatprep.subr.bf16.mxu1 %v2086_v14  ;;  %v2867_v14 = vmul.f32 %v524_v7, %v380_v51 }
 0x134   :  { %1131 = vmatpush1.bf16.msra.mxu1 %v2084_v31 }
 0x137   :  { %1133 = vmatmul.mubr.bf16.vlgmr.msra.gmra.mrb[16].mxu1 %v617_v44  ;;  %v2101_v44 = vld [vmem:[%s3061_s5 + $0x60] sm:$0xff]  }
 0x138   :  { %1142 = vmatprep.mubr.bf16.mxu1 %v622_v5  ;;  %1874 = vmatprep.subr.bf16.mxu0 %v2101_v44  ;;  %v342_v5 = vpop.f32.mrb[19].mxu0 }
 0x139   :  { %1875 = vmatpush3.bf16.msra.mxu0 %v2102_v16  ;;  %v343_v12 = vadd.f32 %v342_v5, %v2841_v23  ;;  %v346_v30 = vpop.f32.mrb[20].mxu0 }
 0x13a   :  { %1876 = vmatprep.subr.bf16.mxu0 %v2103_v18  ;;  %v348_v36 = vpop.f32.mrb[21].mxu0  ;;  %v347_v37 = vadd.f32 %v346_v30, %v2838_v55 }
 0x13b   :  { %v434_v52 = vmul.f32 0.70710677, %v343_v12  ;;  %v349_v20 = vadd.f32 %v348_v36, %v2841_v23 }
 0x13c   :  { %v439_v26 = vmul.f32 0.70710677, %v347_v37  ;;  %v391_v57 = vmul.f32 0.5, %v347_v37 }
 0x13d   :  { %1877 = vmatpush3.bf16.msra.mxu0 %v2104_v47  ;;  %2195 = verf.f32 %v434_v52  ;;  %v440_v54 = vmul.f32 0.70710677, %v349_v20 }
 0x13e   :  { %1878 = vmatprep.subr.bf16.mxu0 %v2105_v22  ;;  %2197 = verf.f32 %v439_v26 }
 0x13f   :  { %1143 = vmatmul.mubr.bf16.gmra.mrb[20].mxu1 %v621_v11  ;;  %v2106_v11 = vld [vmem:[%s3061_s5 + $0x30] sm:$0xff]   ;;  %2199 = verf.f32 %v440_v54 }
 0x140   :  { %1152 = vmatprep.mubr.bf16.mxu1 %v626_v49 }
 0x141   :  { %1879 = vmatpush3.bf16.msra.mxu0 %v2106_v11  ;;  %v392_v11 = vmul.f32 0.5, %v349_v20 }
 0x142   :  { %1880 = vmatprep.subr.bf16.mxu0 %v2107_v4 }
 0x145   :  { %1881 = vmatpush3.bf16.msra.mxu0 %v2108_v33 }
 0x146   :  { %1906 = vmatprep.subr.bf16.mxu0 %v2109_v35 }
 0x147   :  { %1153 = vmatmul.mubr.bf16.gmra.mrb[24].mxu1 %v625_v27  ;;  %v350_v27 = vpop.f32.mrb[22].mxu0 }
 0x148   :  { %1162 = vmatprep.mubr.bf16.mxu1 %v630_v41  ;;  %v352_v39 = vpop.f32.mrb[23].mxu0  ;;  %v351_v43 = vadd.f32 %v350_v27, %v2838_v55  ;;  %v386_v41 = vmul.f32 0.5, %v343_v12 }
 0x149   :  { %v353_v49 = vadd.f32 %v352_v39, %v2841_v23  ;;  %v356_v48 = vpop.f32.mrb[24].mxu0 }
 0x14a   :  { %v445_v56 = vmul.f32 0.70710677, %v351_v43  ;;  %v358_v21 = vpop.f32.mrb[25].mxu0  ;;  %v357_v17 = vadd.f32 %v356_v48, %v2838_v55  ;;  %v397_v5 = vmul.f32 0.5, %v351_v43 }
 0x14b   :  { %v446_v61 = vmul.f32 0.70710677, %v353_v49  ;;  %v360_v40 = vpop.f32.mrb[26].mxu0  ;;  %v359_v13 = vadd.f32 %v358_v21, %v2841_v23  ;;  %v398_v12 = vmul.f32 0.5, %v353_v49 }
 0x14c   :  { %2201 = verf.f32 %v445_v56  ;;  %v362_v8 = vpop.f32.mrb[27].mxu0  ;;  %v361_v38 = vadd.f32 %v360_v40, %v2838_v55  ;;  %v451_v19 = vmul.f32 0.70710677, %v357_v17  ;;  %v403_v54 = vmul.f32 0.5, %v357_v17 }
 0x14d   :  { %2203 = verf.f32 %v446_v61  ;;  %v452_v34 = vmul.f32 0.70710677, %v359_v13  ;;  %v363_v44 = vadd.f32 %v362_v8, %v2841_v23  ;;  %v366_v1 = vpop.f32.mrb[28].mxu0  ;;  %v404_v60 = vmul.f32 0.5, %v359_v13 }
 0x14e   :  { %v457_v18 = vmul.f32 0.70710677, %v361_v38  ;;  %2205 = verf.f32 %v451_v19  ;;  %v368_v22 = vpop.f32.mrb[29].mxu0  ;;  %v367_v29 = vadd.f32 %v366_v1, %v2838_v55  ;;  %v409_v21 = vmul.f32 0.5, %v361_v38 }
 0x14f   :  { %1163 = vmatmul.mubr.bf16.gmra.mrb[28].mxu1 %v629_v15  ;;  %v2194_v15 = vpop.eup %2193  ;;  %v458_v45 = vmul.f32 0.70710677, %v363_v44  ;;  %2207 = verf.f32 %v452_v34  ;;  %v370_v24 = vpop.f32.mrb[30].mxu0  ;;  %v369_v52 = vadd.f32 %v368_v22, %v2841_v23  ;;  %v410_v40 = vmul.f32 0.5, %v363_v44 }
 0x150   :  { %v2196_v42 = vpop.eup %2195  ;;  %v529_v50 = vadd.f32 1.0, %v2194_v15  ;;  %2209 = verf.f32 %v457_v18  ;;  %v372_v4 = vpop.f32.mrb[31].mxu0  ;;  %v371_v33 = vadd.f32 %v370_v24, %v2838_v55  ;;  %v463_v20 = vmul.f32 0.70710677, %v367_v29 }
 0x151   :  { %v530_v31 = vadd.f32 1.0, %v2196_v42  ;;  %v2198_v0 = vpop.eup %2197  ;;  %2211 = verf.f32 %v458_v45  ;;  %v464_v49 = vmul.f32 0.70710677, %v369_v52  ;;  %v373_v56 = vadd.f32 %v372_v4, %v2841_v23 }
 0x152   :  { %v2870_v53 = vmul.f32 %v529_v50, %v385_v9  ;;  %v2200_v25 = vpop.eup %2199  ;;  %v535_v28 = vadd.f32 1.0, %v2198_v0  ;;  %v469_v26 = vmul.f32 0.70710677, %v371_v33  ;;  %2213 = verf.f32 %v463_v20 }
 0x153   :  { %v2873_v16 = vmul.f32 %v530_v31, %v386_v41  ;;  %v536_v6 = vadd.f32 1.0, %v2200_v25  ;;  %2215 = verf.f32 %v464_v49  ;;  %v470_v3 = vmul.f32 0.70710677, %v373_v56 }
 0x154   :  { %v1255_v47 = vpack.c.bf16 %v2870_v53, %v2863_v10  ;;  %v2882_v35 = vmul.f32 %v535_v28, %v391_v57  ;;  %2217 = verf.f32 %v469_v26  ;;  %v415_v13 = vmul.f32 0.5, %v367_v29 }
 0x155   :  { %v1256_v62 = vpack.c.bf16 %v2873_v16, %v2867_v14  ;;  %v2884_v27 = vmul.f32 %v536_v6, %v392_v11  ;;  %2219 = verf.f32 %v470_v3  ;;  %v416_v44 = vmul.f32 0.5, %v369_v52 }
 0x156   :  { %v2202_v46 = vpop.eup %2201  ;;  %v421_v18 = vmul.f32 0.5, %v371_v33  ;;  %v422_v0 = vmul.f32 0.5, %v373_v56 }
 0x157   :  { %v2204_v30 = vpop.eup %2203  ;;  %v541_v36 = vadd.f32 1.0, %v2202_v46  ;;  %v695_v46 = vld [vmem:[%s3063_s4] sm:$0x3] }
 0x158   :  { %v542_v39 = vadd.f32 1.0, %v2204_v30  ;;  %v2206_v61 = vpop.eup %2205  ;;  %v2924_v6 = vrot.slane %v695_v46, %v55_v63  ;;  %v2928_v29 = vrot.slane %v695_v46, %v59_v2 }
 0x159   :  { %v2886_v37 = vmul.f32 %v541_v36, %v397_v5  ;;  %v2208_v32 = vpop.eup %2207  ;;  %v547_v51 = vadd.f32 1.0, %v2206_v61 }
 0x15a   :  { %v2888_v43 = vmul.f32 %v542_v39, %v398_v12  ;;  %v2210_v58 = vpop.eup %2209  ;;  %v548_v9 = vadd.f32 1.0, %v2208_v32 }
 0x15b   :  { %v1259_v55 = vpack.c.bf16 %v2886_v37, %v2882_v35  ;;  %v2212_v15 = vpop.eup %2211  ;;  %v2895_v7 = vmul.f32 %v547_v51, %v403_v54  ;;  %v553_v23 = vadd.f32 1.0, %v2210_v58 }
 0x15c   :  { %v1260_v48 = vpack.c.bf16 %v2888_v43, %v2884_v27  ;;  %v2897_v41 = vmul.f32 %v548_v9, %v404_v60  ;;  %v554_v8 = vadd.f32 1.0, %v2212_v15  ;;  %v2214_v38 = vpop.eup %2213 }
 0x15d   :  { %v2899_v42 = vmul.f32 %v553_v23, %v409_v21  ;;  %v2216_v19 = vpop.eup %2215  ;;  %v559_v34 = vadd.f32 1.0, %v2214_v38 }
 0x15e   :  { %v2901_v50 = vmul.f32 %v554_v8, %v410_v40  ;;  %v2218_v45 = vpop.eup %2217  ;;  %v560_v1 = vadd.f32 1.0, %v2216_v19 }
 0x15f   :  { %v1263_v17 = vpack.c.bf16 %v2899_v42, %v2895_v7  ;;  %v2907_v57 = vmul.f32 %v559_v34, %v415_v13  ;;  %v565_v22 = vadd.f32 1.0, %v2218_v45  ;;  %v2220_v11 = vpop.eup %2219 }
 0x160   :  { %v1264_v31 = vpack.c.bf16 %v2901_v50, %v2897_v41  ;;  %v2909_v24 = vmul.f32 %v560_v1, %v416_v44  ;;  %v566_v28 = vadd.f32 1.0, %v2220_v11 }
 0x161   :  { %v2911_v25 = vmul.f32 %v565_v22, %v421_v18 }
 0x162   :  { %v2913_v5 = vmul.f32 %v566_v28, %v422_v0 }
 0x163   :  { %v1267_v12 = vpack.c.bf16 %v2911_v25, %v2907_v57 }
 0x164   :  { %v1268_v4 = vpack.c.bf16 %v2913_v5, %v2909_v24 }
 0x20a   :  { %v1134_v52 = vpop.f32.mrb[16].mxu1 }
 0x20b   :  { %v1946_v33 = vadd.f32 %v1134_v52, %v2924_v6  ;;  %v1136_v30 = vpop.f32.mrb[17].mxu1 }
 0x20c   :  { %v1947_v36 = vadd.f32 %v1136_v30, %v2928_v29  ;;  %v1138_v39 = vpop.f32.mrb[18].mxu1 }
 0x20d   :  { %v1189_v20 = vmul.f32 0.70710677, %v1946_v33  ;;  %v1948_v49 = vadd.f32 %v1138_v39, %v2924_v6  ;;  %v1140_v26 = vpop.f32.mrb[19].mxu1  ;;  %v1173_v22 = vmul.f32 0.5, %v1946_v33 }
 0x20e   :  { %v1190_v54 = vmul.f32 0.70710677, %v1947_v36  ;;  %v1949_v56 = vadd.f32 %v1140_v26, %v2928_v29  ;;  %v1174_v52 = vmul.f32 0.5, %v1947_v36 }
 0x20f   :  { %2221 = verf.f32 %v1189_v20  ;;  %v1191_v63 = vmul.f32 0.70710677, %v1948_v49  ;;  %v1175_v0 = vmul.f32 0.5, %v1948_v49 }
 0x210   :  { %2223 = verf.f32 %v1190_v54  ;;  %v1192_v59 = vmul.f32 0.70710677, %v1949_v56  ;;  %v1176_v30 = vmul.f32 0.5, %v1949_v56 }
 0x211   :  { %2225 = verf.f32 %v1191_v63 }
 0x212   :  { %2227 = verf.f32 %v1192_v59  ;;  %v1144_v2 = vpop.f32.mrb[20].mxu1 }
 0x213   :  { %v1950_v61 = vadd.f32 %v1144_v2, %v2924_v6  ;;  %v1146_v60 = vpop.f32.mrb[21].mxu1 }
 0x214   :  { %v2936_v32 = vadd.f32 %v1146_v60, %v2928_v29  ;;  %v1148_v51 = vpop.f32.mrb[22].mxu1 }
 0x215   :  { %v1193_v21 = vmul.f32 0.70710677, %v1950_v61  ;;  %v1952_v3 = vadd.f32 %v1148_v51, %v2924_v6  ;;  %v1150_v58 = vpop.f32.mrb[23].mxu1 }
 0x216   :  { %v1194_v9 = vmul.f32 0.70710677, %v2936_v32  ;;  %v1953_v40 = vadd.f32 %v1150_v58, %v2928_v29 }
 0x217   :  { %2229 = verf.f32 %v1193_v21  ;;  %v1195_v15 = vmul.f32 0.70710677, %v1952_v3 }
 0x218   :  { %2231 = verf.f32 %v1194_v9  ;;  %v1196_v23 = vmul.f32 0.70710677, %v1953_v40  ;;  %v2110_v9 = vld [vmem:[%s3061_s5 + $0x80] sm:$0xff]  }
 0x219   :  { %v2222_v8 = vpop.eup %2221  ;;  %2233 = verf.f32 %v1195_v15 }
 0x21a   :  { %v2224_v13 = vpop.eup %2223  ;;  %v1221_v38 = vadd.f32 1.0, %v2222_v8  ;;  %2235 = verf.f32 %v1196_v23  ;;  %v1154_v19 = vpop.f32.mrb[24].mxu1 }
 0x21b   :  { %v2226_v34 = vpop.eup %2225  ;;  %v1222_v44 = vadd.f32 1.0, %v2224_v13  ;;  %v2942_v18 = vadd.f32 %v1154_v19, %v2924_v6  ;;  %v1156_v45 = vpop.f32.mrb[25].mxu1  ;;  %v2111_v13 = vld [vmem:[%s3061_s5 + $0xc8] sm:$0xff]  }
 0x21c   :  { %v2228_v1 = vpop.eup %2227  ;;  %v1223_v11 = vadd.f32 1.0, %v2226_v34  ;;  %v2945_v28 = vadd.f32 %v1156_v45, %v2928_v29  ;;  %v1158_v46 = vpop.f32.mrb[26].mxu1  ;;  %v1237_v54 = vmul.f32 %v1221_v38, %v1173_v22  ;;  %v1179_v22 = vmul.f32 0.5, %v1952_v3 }
 0x21d   :  { %v1224_v39 = vadd.f32 1.0, %v2228_v1  ;;  %v1197_v20 = vmul.f32 0.70710677, %v2942_v18  ;;  %v1160_v26 = vpop.f32.mrb[27].mxu1  ;;  %v2950_v2 = vadd.f32 %v1158_v46, %v2924_v6  ;;  %v1238_v33 = vmul.f32 %v1222_v44, %v1174_v52  ;;  %v2112_v52 = vld [vmem:[%s3061_s5 + $0x88] sm:$0xff]  }
 0x21e   :  { %v1239_v63 = vmul.f32 %v1223_v11, %v1175_v0  ;;  %v1198_v59 = vmul.f32 0.70710677, %v2945_v28  ;;  %v2953_v60 = vadd.f32 %v1160_v26, %v2928_v29  ;;  %v1177_v1 = vmul.f32 0.5, %v1950_v61 }
 0x21f   :  { %v1240_v49 = vmul.f32 %v1224_v39, %v1176_v30  ;;  %2237 = verf.f32 %v1197_v20  ;;  %v1199_v36 = vmul.f32 0.70710677, %v2950_v2  ;;  %v1178_v30 = vmul.f32 0.5, %v2936_v32 }
 0x220   :  { %v1253_v51 = vpack.c.bf16 %v1239_v63, %v1237_v54  ;;  %2239 = verf.f32 %v1198_v59  ;;  %v1200_v21 = vmul.f32 0.70710677, %v2953_v60  ;;  %v1180_v39 = vmul.f32 0.5, %v1953_v40 }
 0x221   :  { %v2230_v56 = vpop.eup %2229  ;;  %v1254_v58 = vpack.c.bf16 %v1240_v49, %v1238_v33  ;;  %2241 = verf.f32 %v1199_v36  ;;  %v2113_v33 = vld [vmem:[%s3061_s5 + $0xd0] sm:$0xff]  }
 0x222   :  { %v2232_v15 = vpop.eup %2231  ;;  %v1225_v23 = vadd.f32 1.0, %v2230_v56  ;;  %v1164_v8 = vpop.f32.mrb[28].mxu1  ;;  %2243 = verf.f32 %v1200_v21 }
 0x223   :  { %v2234_v38 = vpop.eup %2233  ;;  %v1226_v19 = vadd.f32 1.0, %v2232_v15  ;;  %v2964_v34 = vadd.f32 %v1164_v8, %v2924_v6  ;;  %v1166_v44 = vpop.f32.mrb[29].mxu1  ;;  %1564 = vmatprep.mubr.bf16.mxu0 %v1254_v58  ;;  %v2115_v15 = vld [vmem:[%s3061_s5 + $0xd8] sm:$0xff]  }
 0x224   :  { %v2236_v45 = vpop.eup %2235  ;;  %v1227_v0 = vadd.f32 1.0, %v2234_v38  ;;  %v2967_v11 = vadd.f32 %v1166_v44, %v2928_v29  ;;  %v1168_v46 = vpop.f32.mrb[30].mxu1  ;;  %1565 = vmatmul.mubr.bf16.vlgmr.msra.gmra.mrb[32].mxu0 %v1253_v51  ;;  %v1241_v61 = vmul.f32 %v1225_v23, %v1177_v1  ;;  %v1181_v38 = vmul.f32 0.5, %v2942_v18 }
 0x225   :  { %v1228_v20 = vadd.f32 1.0, %v2236_v45  ;;  %v1201_v26 = vmul.f32 0.70710677, %v2964_v34  ;;  %1907 = vmatpush3.bf16.msra.mxu0 %v2110_v9  ;;  %v1170_v54 = vpop.f32.mrb[31].mxu1  ;;  %v1960_v59 = vadd.f32 %v1168_v46, %v2924_v6  ;;  %v1242_v49 = vmul.f32 %v1226_v19, %v1178_v30  ;;  %v2114_v6 = vld [vmem:[%s3061_s5 + $0x90] sm:$0xff]   ;;  %v2116_v45 = vld [vmem:[%s3061_s5 + $0x98] sm:$0xff]  }
 0x226   :  { %v1243_v3 = vmul.f32 %v1227_v0, %v1179_v22  ;;  %v1202_v63 = vmul.f32 0.70710677, %v2967_v11  ;;  %1908 = vmatprep.subr.bf16.mxu0 %v2111_v13  ;;  %v1961_v32 = vadd.f32 %v1170_v54, %v2928_v29  ;;  %v1183_v19 = vmul.f32 0.5, %v2950_v2  ;;  %v2117_v46 = vld [vmem:[%s3061_s5 + $0xe0] sm:$0xff]  }
 0x227   :  { %v1244_v51 = vmul.f32 %v1228_v20, %v1180_v39  ;;  %2245 = verf.f32 %v1201_v26  ;;  %v1203_v40 = vmul.f32 0.70710677, %v1960_v59  ;;  %v1182_v1 = vmul.f32 0.5, %v2945_v28  ;;  %v2118_v28 = vld [vmem:[%s3061_s5 + $0xa0] sm:$0xff]  }
 0x228   :  { %2247 = verf.f32 %v1202_v63  ;;  %v1257_v36 = vpack.c.bf16 %v1243_v3, %v1241_v61  ;;  %v1204_v21 = vmul.f32 0.70710677, %v1961_v32  ;;  %v1184_v22 = vmul.f32 0.5, %v2953_v60  ;;  %v2119_v61 = vld [vmem:[%s3061_s5 + $0xe8] sm:$0xff]  }
 0x229   :  { %v2238_v56 = vpop.eup %2237  ;;  %1909 = vmatpush3.bf16.msra.mxu0 %v2112_v52  ;;  %v1258_v58 = vpack.c.bf16 %v1244_v51, %v1242_v49  ;;  %2249 = verf.f32 %v1203_v40  ;;  %v1185_v49 = vmul.f32 0.5, %v2964_v34  ;;  %v1187_v51 = vmul.f32 0.5, %v1960_v59 }
 0x22a   :  { %v2240_v9 = vpop.eup %2239  ;;  %1910 = vmatprep.subr.bf16.mxu0 %v2113_v33  ;;  %v1229_v23 = vadd.f32 1.0, %v2238_v56  ;;  %2251 = verf.f32 %v1204_v21  ;;  %v1188_v56 = vmul.f32 0.5, %v1961_v32  ;;  %v2123_v32 = vld [vmem:[%s3061_s5 + $0xf8] sm:$0xff]  }
 0x22b   :  { %1572 = vmatprep.mubr.bf16.mxu0 %v1258_v58  ;;  %v2242_v29 = vpop.eup %2241  ;;  %v1230_v8 = vadd.f32 1.0, %v2240_v9  ;;  %v2120_v58 = vld [vmem:[%s3061_s5 + $0xa8] sm:$0xff]  }
 0x22c   :  { %1573 = vmatmul.mubr.bf16.gmra.mrb[36].mxu0 %v1257_v36  ;;  %v2244_v13 = vpop.eup %2243  ;;  %v1231_v44 = vadd.f32 1.0, %v2242_v29  ;;  %v1245_v52 = vmul.f32 %v1229_v23, %v1181_v38  ;;  %v1186_v36 = vmul.f32 0.5, %v2967_v11  ;;  %v2122_v11 = vld [vmem:[%s3061_s5 + $0xb0] sm:$0xff]  }
 0x22d   :  { %1911 = vmatpush3.bf16.msra.mxu0 %v2114_v6  ;;  %v1232_v0 = vadd.f32 1.0, %v2244_v13  ;;  %v1246_v30 = vmul.f32 %v1230_v8, %v1182_v1  ;;  %v2124_v8 = vld [vmem:[%s3061_s5 + $0xb8] sm:$0xff]   ;;  %v1794_v13 = vld [vmem:[%s3064_s6] ss:$0 sm:$0xff] }
 0x22e   :  { %1912 = vmatprep.subr.bf16.mxu0 %v2115_v15  ;;  %v1247_v18 = vmul.f32 %v1231_v44, %v1183_v19  ;;  %v2121_v15 = vld [vmem:[%s3061_s5 + $0xf0] sm:$0xff]  }
 0x22f   :  { %v1248_v2 = vmul.f32 %v1232_v0, %v1184_v22 }
 0x230   :  { %v1261_v20 = vpack.c.bf16 %v1247_v18, %v1245_v52 }
 0x231   :  { %v2246_v39 = vpop.eup %2245  ;;  %1913 = vmatpush3.bf16.msra.mxu0 %v2116_v45  ;;  %v1262_v54 = vpack.c.bf16 %v1248_v2, %v1246_v30 }
 0x232   :  { %v2248_v26 = vpop.eup %2247  ;;  %1914 = vmatprep.subr.bf16.mxu0 %v2117_v46  ;;  %v1233_v60 = vadd.f32 1.0, %v2246_v39 }
 0x233   :  { %v2250_v3 = vpop.eup %2249  ;;  %v1234_v63 = vadd.f32 1.0, %v2248_v26  ;;  %1580 = vmatprep.mubr.bf16.mxu0 %v1262_v54 }
 0x234   :  { %v2252_v33 = vpop.eup %2251  ;;  %v1235_v40 = vadd.f32 1.0, %v2250_v3  ;;  %1581 = vmatmul.mubr.bf16.gmra.mrb[40].mxu0 %v1261_v20  ;;  %v1249_v6 = vmul.f32 %v1233_v60, %v1185_v49 }
 0x235   :  { %v1236_v21 = vadd.f32 1.0, %v2252_v33  ;;  %1915 = vmatpush3.bf16.msra.mxu0 %v2118_v28  ;;  %v1250_v34 = vmul.f32 %v1234_v63, %v1186_v36 }
 0x236   :  { %v1251_v9 = vmul.f32 %v1235_v40, %v1187_v51  ;;  %1916 = vmatprep.subr.bf16.mxu0 %v2119_v61 }
 0x237   :  { %v1252_v59 = vmul.f32 %v1236_v21, %v1188_v56 }
 0x238   :  { %v1265_v23 = vpack.c.bf16 %v1251_v9, %v1249_v6 }
 0x239   :  { %1917 = vmatpush3.bf16.msra.mxu0 %v2120_v58  ;;  %v1266_v29 = vpack.c.bf16 %v1252_v59, %v1250_v34 }
 0x23a   :  { %1918 = vmatprep.subr.bf16.mxu0 %v2121_v15 }
 0x23b   :  { %1588 = vmatprep.mubr.bf16.mxu0 %v1266_v29 }
 0x23c   :  { %1589 = vmatmul.mubr.bf16.gmra.mrb[44].mxu0 %v1265_v23 }
 0x23d   :  { %1919 = vmatpush3.bf16.msra.mxu0 %v2122_v11  ;;  %1629 = vmatprep.mubr.bf16.mxu0 %v1256_v62 }
 0x23e   :  { %1920 = vmatprep.subr.bf16.mxu0 %v2123_v32 }
 0x241   :  { %1921 = vmatpush3.bf16.msra.mxu0 %v2124_v8 }
 0x244   :  { %1630 = vmatmul.mubr.bf16.vlgmr.msra.gmra.mrb[48].mxu0 %v1255_v47 }
 0x245   :  { %1637 = vmatprep.mubr.bf16.mxu0 %v1260_v48 }
 0x24c   :  { %1638 = vmatmul.mubr.bf16.gmra.mrb[52].mxu0 %v1259_v55 }
 0x24d   :  { %1645 = vmatprep.mubr.bf16.mxu0 %v1264_v31 }
 0x254   :  { %1646 = vmatmul.mubr.bf16.gmra.mrb[56].mxu0 %v1263_v17 }
 0x255   :  { %1653 = vmatprep.mubr.bf16.mxu0 %v1268_v4 }
 0x25c   :  { %1654 = vmatmul.mubr.bf16.gmra.mrb[60].mxu0 %v1267_v12 }
 0x2f7   :  { %v1882_v10 = vpop.f32.mrb[32].mxu0 }
 0x2f8   :  { %v1883_v14 = vpop.f32.mrb[33].mxu0 }
 0x2f9   :  { %v1884_v53 = vadd.f32 %v1883_v14, %v1882_v10  ;;  %v1885_v16 = vpop.f32.mrb[34].mxu0 }
 0x2fa   :  { %v1886_v47 = vpop.f32.mrb[35].mxu0 }
 0x2fb   :  { %v1887_v62 = vadd.f32 %v1886_v47, %v1885_v16  ;;  %v1567_v44 = vadd.f32 %v1884_v53, %v1794_v13 }
 0x2fd   :  { %v1570_v0 = vadd.f32 %v1887_v62, %v1794_v13 }
 0x2ff   :  { %v1888_v35 = vpop.f32.mrb[36].mxu0 }
 0x300   :  { %v1889_v27 = vpop.f32.mrb[37].mxu0 }
 0x301   :  { %v1890_v37 = vadd.f32 %v1889_v27, %v1888_v35  ;;  %v1891_v43 = vpop.f32.mrb[38].mxu0 }
 0x302   :  { %v1892_v55 = vpop.f32.mrb[39].mxu0 }
 0x303   :  { %v1893_v48 = vadd.f32 %v1892_v55, %v1891_v43  ;;  %v1575_v20 = vadd.f32 %v1890_v37, %v1794_v13 }
 0x305   :  { %v1578_v60 = vadd.f32 %v1893_v48, %v1794_v13 }
 0x307   :  { %v1894_v7 = vpop.f32.mrb[40].mxu0 }
 0x308   :  { %v1895_v41 = vpop.f32.mrb[41].mxu0 }
 0x309   :  { %v1896_v42 = vadd.f32 %v1895_v41, %v1894_v7  ;;  %v1897_v50 = vpop.f32.mrb[42].mxu0 }
 0x30a   :  { %v1898_v17 = vpop.f32.mrb[43].mxu0 }
 0x30b   :  { %v1899_v31 = vadd.f32 %v1898_v17, %v1897_v50  ;;  %v1583_v40 = vadd.f32 %v1896_v42, %v1794_v13 }
 0x30d   :  { %v1586_v58 = vadd.f32 %v1899_v31, %v1794_v13 }
 0x30f   :  { %v1900_v57 = vpop.f32.mrb[44].mxu0 }
 0x310   :  { %v1901_v24 = vpop.f32.mrb[45].mxu0 }
 0x311   :  { %v1902_v25 = vadd.f32 %v1901_v24, %v1900_v57  ;;  %v1903_v5 = vpop.f32.mrb[46].mxu0 }
 0x312   :  { %v1904_v12 = vpop.f32.mrb[47].mxu0 }
 0x313   :  { %v1905_v4 = vadd.f32 %v1904_v12, %v1903_v5  ;;  %v1591_v29 = vadd.f32 %v1902_v25, %v1794_v13 }
 0x315   :  { %v1594_v10 = vadd.f32 %v1905_v4, %v1794_v13 }
 0x317   :  { %v1922_v38 = vpop.f32.mrb[48].mxu0 }
 0x318   :  { %v1923_v19 = vpop.f32.mrb[49].mxu0 }
 0x319   :  { %v1924_v45 = vadd.f32 %v1923_v19, %v1922_v38  ;;  %v1925_v1 = vpop.f32.mrb[50].mxu0 }
 0x31a   :  { %v1926_v22 = vpop.f32.mrb[51].mxu0 }
 0x31b   :  { %v1632_v46 = vadd.f32 %v1924_v45, %v1567_v44  ;;  %v1927_v52 = vadd.f32 %v1926_v22, %v1925_v1 }
 0x31d   :  { %v1635_v18 = vadd.f32 %v1927_v52, %v1570_v0 }
 0x31f   :  { %v1846_v30 = vpack.c.bf16 %v1635_v18, %v1632_v46  ;;  %v1928_v2 = vpop.f32.mrb[52].mxu0 }
 0x320   :  { %v1929_v39 = vpop.f32.mrb[53].mxu0 }
 0x321   :  { %1847 = vst [vmem:[%s3065_s7] sm:$0xff] %v1846_v30   ;;  %v1930_v26 = vadd.f32 %v1929_v39, %v1928_v2  ;;  %v1931_v54 = vpop.f32.mrb[54].mxu0 }
 0x322   :  { %v1932_v28 = vpop.f32.mrb[55].mxu0 }
 0x323   :  { %v1640_v61 = vadd.f32 %v1930_v26, %v1575_v20  ;;  %v1933_v3 = vadd.f32 %v1932_v28, %v1931_v54 }
 0x325   :  { %v1643_v63 = vadd.f32 %v1933_v3, %v1578_v60 }
 0x327   :  { %v1851_v33 = vpack.c.bf16 %v1643_v63, %v1640_v61  ;;  %v1934_v49 = vpop.f32.mrb[56].mxu0 }
 0x328   :  { %v1935_v51 = vpop.f32.mrb[57].mxu0 }
 0x329   :  { %1863 = vst [vmem:[%s3065_s7 + $0x8] sm:$0xff] %v1851_v33   ;;  %v1936_v36 = vadd.f32 %v1935_v51, %v1934_v49  ;;  %v1937_v56 = vpop.f32.mrb[58].mxu0 }
 0x32a   :  { %v1938_v21 = vpop.f32.mrb[59].mxu0 }
 0x32b   :  { %v1648_v6 = vadd.f32 %v1936_v36, %v1583_v40  ;;  %v1939_v9 = vadd.f32 %v1938_v21, %v1937_v56 }
 0x32d   :  { %v1651_v15 = vadd.f32 %v1939_v9, %v1586_v58 }
 0x32f   :  { %v1856_v34 = vpack.c.bf16 %v1651_v15, %v1648_v6  ;;  %v1940_v59 = vpop.f32.mrb[60].mxu0 }
 0x330   :  { %v1941_v23 = vpop.f32.mrb[61].mxu0 }
 0x331   :  { %1864 = vst [vmem:[%s3065_s7 + $0x10] sm:$0xff] %v1856_v34   ;;  %v1942_v11 = vadd.f32 %v1941_v23, %v1940_v59  ;;  %v1943_v32 = vpop.f32.mrb[62].mxu0 }
 0x332   :  { %v1944_v8 = vpop.f32.mrb[63].mxu0 }
 0x333   :  { %v1656_v14 = vadd.f32 %v1942_v11, %v1591_v29  ;;  %v1945_v53 = vadd.f32 %v1944_v8, %v1943_v32 }
 0x335   :  { %v1659_v16 = vadd.f32 %v1945_v53, %v1594_v10 }
 0x337   :  { %v1861_v47 = vpack.c.bf16 %v1659_v16, %v1656_v14 }
 0x339   :  { %1865 = vst [vmem:[%s3065_s7 + $0x18] sm:$0xff] %v1861_v47  }

</bundles_post_ra>
